<compile_context>
chip_gen: v5e
topology: v5e:2x2
jax: 0.10.0
libtpu: 0.0.40
codegen_flags: <defaults>
</compile_context>

<pallas_src>
import numpy as np
import jax
import jax.numpy as jnp
from jax import lax
from jax.experimental import pallas as pl
from jax.experimental.pallas import tpu as pltpu

EMB = 128          # embedding_dim
HID = 128          # hidden_dim (module's concat requires hidden_dim == embedding_dim)
MLP = 100          # hard-coded 100-unit MLP in the module
MLP_PAD = 128      # lane-dense padding of the MLP width
SEQ = 8            # relation sequence length
BATCH = 16
ENT_VOCAB = 50
REL_VOCAB = 20


def _reward_kernel(so_ref, r_ref, wih_ref, whh_ref, b_ref,
                   w1so_ref, w1h_ref, b1_ref, w2_ref, b2_ref,
                   out_ref, gates_scr):
    T, B, E = r_ref.shape          # B here is the per-program batch block BB
    H = HID

    # ---- hoisted LSTM input projection: ONE (T*B, E) @ (E, 4H) matmul + bias
    x_all = r_ref[...].reshape(T * B, E)                       # bf16
    gates_in = (jnp.dot(x_all, wih_ref[...],
                        preferred_element_type=jnp.float32)
                + b_ref[...])                                   # (T*B, 4H) f32
    gates_scr[...] = gates_in.reshape(T, B, 4 * H)

    # ---- s/o contribution to the MLP (independent of the recurrence) ----
    so_hidden = (jnp.dot(so_ref[...], w1so_ref[...],
                         preferred_element_type=jnp.float32)
                 + b1_ref[...])                                 # (B, MLP_PAD)

    # ---- backward-direction LSTM (this is h[-1] of the bidirectional LSTM);
    #      h carried in bf16 (MXU input dtype), c in f32, both in vregs.
    def step(k, carry):
        h, c = carry
        t = T - 1 - k                                           # reverse time
        gates = gates_scr[t] + jnp.dot(h, whh_ref[...],
                                       preferred_element_type=jnp.float32)
        i_g = jax.nn.sigmoid(gates[:, 0 * H:1 * H])             # PyTorch order
        f_g = jax.nn.sigmoid(gates[:, 1 * H:2 * H])             # [i, f, g, o]
        g_g = jnp.tanh(gates[:, 2 * H:3 * H])
        o_g = jax.nn.sigmoid(gates[:, 3 * H:4 * H])
        c_new = f_g * c + i_g * g_g
        h_new = (o_g * jnp.tanh(c_new)).astype(jnp.bfloat16)
        return (h_new, c_new)

    h0 = jnp.zeros((B, H), jnp.bfloat16)
    c0 = jnp.zeros((B, H), jnp.float32)
    h, _ = lax.fori_loop(0, T, step, (h0, c0), unroll=True)

    # ---- MLP: relu(Linear(cat([s, h_bwd, o]))) as split matmuls ----
    hidden = so_hidden + jnp.dot(h, w1h_ref[...],
                                 preferred_element_type=jnp.float32)
    hidden = jnp.maximum(hidden, 0.0)

    # ---- output head (N=1): VPU multiply + lane reduce, then sigmoid ----
    logit = jnp.sum(hidden * w2_ref[...], axis=-1, keepdims=True) + b2_ref[...]
    # lane-dense store: broadcast across all 128 lanes -> unmasked vst;
    # wrapper slices column 0.
    out_ref[...] = jnp.broadcast_to(jax.nn.sigmoid(logit), (B, MLP_PAD))


def prepare_params(p):
    """Pack raw f32 params into kernel-ready form (bf16 MXU weights,
    MLP padded 100 -> 128 with exact zeros, [s|o] columns fused)."""
    pad = MLP_PAD - MLP
    w1so = jnp.concatenate([p["w1s"], p["w1o"]], axis=0)        # (2E, MLP)
    return {
        "wih":  p["wih"].astype(jnp.bfloat16),                  # (E, 4H)
        "whh":  p["whh"].astype(jnp.bfloat16),                  # (H, 4H)
        "b":    p["b"].astype(jnp.float32),                     # (1, 4H)
        "w1so": jnp.pad(w1so, ((0, 0), (0, pad))).astype(jnp.bfloat16),
        "w1h":  jnp.pad(p["w1h"], ((0, 0), (0, pad))).astype(jnp.bfloat16),
        "b1":   jnp.pad(p["b1"], ((0, 0), (0, pad))).astype(jnp.float32),
        "w2r":  jnp.pad(p["w2"].T, ((0, 0), (0, pad))).astype(jnp.float32),
        "b2":   p["b2"].astype(jnp.float32),                    # (1, 1)
    }


def _pick_bb(B):
    """Largest sublane-aligned batch block <=128 dividing B; halve once if
    that would leave a single grid program (v7x megacore wants >=2)."""
    bb = 8
    for cand in (128, 64, 32, 16, 8):
        if B % cand == 0:
            bb = cand
            break
    if B // bb == 1 and bb >= 16:
        bb //= 2
    return bb


def reward_forward(s_emb, o_emb, r_emb_tbe, kp):
    """s_emb:(B,E) o_emb:(B,E) r_emb_tbe:(T,B,E) -> (B,1) sigmoid score."""
    T, B, E = r_emb_tbe.shape
    assert E == EMB and B % 8 == 0
    BB = _pick_bb(B)

    # bf16 inputs: halves the HBM->VMEM DMA; MXU operands were bf16 already.
    so = jnp.concatenate([s_emb, o_emb], axis=1).astype(jnp.bfloat16)  # (B,2E)
    r = r_emb_tbe.astype(jnp.bfloat16)                                 # (T,B,E)

    def _full(shape):
        n = len(shape)
        return pl.BlockSpec(shape, lambda i, n=n: (0,) * n)

    args = (so, r, kp["wih"], kp["whh"], kp["b"],
            kp["w1so"], kp["w1h"], kp["b1"], kp["w2r"], kp["b2"])
    in_specs = [
        pl.BlockSpec((BB, 2 * E), lambda i: (i, 0)),            # s|o, per block
        pl.BlockSpec((T, BB, E), lambda i: (0, i, 0)),          # r, per block
    ] + [_full(a.shape) for a in args[2:]]                      # weights: bcast

    out_wide = pl.pallas_call(
        _reward_kernel,
        out_shape=jax.ShapeDtypeStruct((B, MLP_PAD), jnp.float32),
        grid=(B // BB,),
        in_specs=in_specs,
        out_specs=pl.BlockSpec((BB, MLP_PAD), lambda i: (i, 0)),
        scratch_shapes=[pltpu.VMEM((T, BB, 4 * HID), jnp.float32)],  # gates
        compiler_params=pltpu.CompilerParams(
            dimension_semantics=("parallel",)),
    )(*args)
    return out_wide[:, :1]


def _reference(s_emb, o_emb, r_emb_bte, p):
    """Pure-JAX f32 reference of the same math (backward LSTM + MLP + sigmoid)."""
    B, T, _ = r_emb_bte.shape
    hp = jax.lax.Precision.HIGHEST
    h = jnp.zeros((B, HID), jnp.float32)
    c = jnp.zeros((B, HID), jnp.float32)
    for k in range(T):
        t = T - 1 - k
        x = r_emb_bte[:, t, :]
        gates = (jnp.dot(x, p["wih"], precision=hp)
                 + jnp.dot(h, p["whh"], precision=hp) + p["b"])
        i = jax.nn.sigmoid(gates[:, :HID])
        f = jax.nn.sigmoid(gates[:, HID:2 * HID])
        g = jnp.tanh(gates[:, 2 * HID:3 * HID])
        o = jax.nn.sigmoid(gates[:, 3 * HID:])
        c = f * c + i * g
        h = o * jnp.tanh(c)
    hid = jnp.maximum(jnp.dot(s_emb, p["w1s"], precision=hp)
                      + jnp.dot(h, p["w1h"], precision=hp)
                      + jnp.dot(o_emb, p["w1o"], precision=hp) + p["b1"], 0.0)
    return jax.nn.sigmoid(jnp.dot(hid, p["w2"], precision=hp) + p["b2"])


if __name__ == "__main__":
    key = jax.random.PRNGKey(0)
    ks = jax.random.split(key, 16)
    scale = 0.1

    # embedding tables (stand-ins for the "pretrained" ent_emb / rel_emb)
    ent_emb = scale * jax.random.normal(ks[0], (ENT_VOCAB, EMB), jnp.float32)
    rel_emb = scale * jax.random.normal(ks[1], (REL_VOCAB, EMB), jnp.float32)

    # LSTM (reverse direction) weights, pre-transposed to (in, 4H);
    # combined bias b = b_ih + b_hh of the reverse-direction nn.LSTM.
    params = {
        "wih": scale * jax.random.normal(ks[2], (EMB, 4 * HID), jnp.float32),
        "whh": scale * jax.random.normal(ks[3], (HID, 4 * HID), jnp.float32),
        "b":   scale * jax.random.normal(ks[4], (1, 4 * HID), jnp.float32),
        # mlp = Linear(3*EMB, 100) split column-wise into [s | h | o] chunks
        "w1s": scale * jax.random.normal(ks[5], (EMB, MLP), jnp.float32),
        "w1h": scale * jax.random.normal(ks[6], (HID, MLP), jnp.float32),
        "w1o": scale * jax.random.normal(ks[7], (EMB, MLP), jnp.float32),
        "b1":  scale * jax.random.normal(ks[8], (1, MLP), jnp.float32),
        # output = Linear(100, 1)
        "w2":  scale * jax.random.normal(ks[9], (MLP, 1), jnp.float32),
        "b2":  scale * jax.random.normal(ks[10], (1, 1), jnp.float32),
    }
    kparams = prepare_params(params)

    # forward inputs: subject/object are (B,1) index tensors, relation is (B,T)
    subject = jax.random.randint(ks[11], (BATCH, 1), 0, ENT_VOCAB, jnp.int32)
    obj     = jax.random.randint(ks[12], (BATCH, 1), 0, ENT_VOCAB, jnp.int32)
    relation = jax.random.randint(ks[13], (BATCH, SEQ), 0, REL_VOCAB, jnp.int32)

    # embedding gathers + squeeze() are glue, done in plain JAX.
    # r is gathered directly in (T, B, E) layout (transpose the small int index
    # array, not the big float tensor).
    s_emb = jnp.take(ent_emb, subject[:, 0], axis=0)            # (B, E)
    o_emb = jnp.take(ent_emb, obj[:, 0], axis=0)                # (B, E)
    r_emb_tbe = jnp.take(rel_emb, relation.T, axis=0)           # (T, B, E)

    fwd = jax.jit(reward_forward)
    out = fwd(s_emb, o_emb, r_emb_tbe, kparams)
    out = jax.block_until_ready(out)

    r_emb_bte = jnp.take(rel_emb, relation, axis=0)             # (B, T, E)
    ref = jax.block_until_ready(_reference(s_emb, o_emb, r_emb_bte, params))
    np.testing.assert_allclose(np.asarray(out), np.asarray(ref), atol=2e-2, rtol=0)
    assert out.shape == (BATCH, 1)

    print("KERNEL_OK")
</pallas_src>

<mosaic_0001>
module attributes {stable_mosaic.version = 11 : i64} {
  func.func @_reward_kernel(%arg0: i32, %arg1: memref<8x256xbf16, #tpu.memory_space<vmem>>, %arg2: memref<8x8x128xbf16, #tpu.memory_space<vmem>>, %arg3: memref<128x512xbf16, #tpu.memory_space<vmem>>, %arg4: memref<128x512xbf16, #tpu.memory_space<vmem>>, %arg5: memref<1x512xf32, #tpu.memory_space<vmem>>, %arg6: memref<256x128xbf16, #tpu.memory_space<vmem>>, %arg7: memref<128x128xbf16, #tpu.memory_space<vmem>>, %arg8: memref<1x128xf32, #tpu.memory_space<vmem>>, %arg9: memref<1x128xf32, #tpu.memory_space<vmem>>, %arg10: memref<1x1xf32, #tpu.memory_space<vmem>>, %arg11: memref<8x128xf32, #tpu.memory_space<vmem>>, %arg12: memref<8x8x512xf32, #tpu.memory_space<vmem>>) attributes {dimension_semantics = [#tpu.dimension_semantics<parallel>], iteration_bounds = array<i64: 2>, scalar_prefetch = 0 : i64, scratch_operands = 1 : i64, tpu.core_type = #tpu.core_type<tc>, window_params = [{transform_indices = @transform_0, window_bounds = array<i64: 8, 256>}, {transform_indices = @transform_1, window_bounds = array<i64: 8, 8, 128>}, {pipeline_mode = #tpu.pipeline_mode<synchronous>, transform_indices = @transform_2, window_bounds = array<i64: 128, 512>}, {pipeline_mode = #tpu.pipeline_mode<synchronous>, transform_indices = @transform_3, window_bounds = array<i64: 128, 512>}, {pipeline_mode = #tpu.pipeline_mode<synchronous>, transform_indices = @transform_4, window_bounds = array<i64: 1, 512>}, {pipeline_mode = #tpu.pipeline_mode<synchronous>, transform_indices = @transform_5, window_bounds = array<i64: 256, 128>}, {pipeline_mode = #tpu.pipeline_mode<synchronous>, transform_indices = @transform_6, window_bounds = array<i64: 128, 128>}, {pipeline_mode = #tpu.pipeline_mode<synchronous>, transform_indices = @transform_7, window_bounds = array<i64: 1, 128>}, {pipeline_mode = #tpu.pipeline_mode<synchronous>, transform_indices = @transform_8, window_bounds = array<i64: 1, 128>}, {pipeline_mode = #tpu.pipeline_mode<synchronous>, transform_indices = @transform_9, window_bounds = array<i64: 1, 1>}, {transform_indices = @transform_10, window_bounds = array<i64: 8, 128>}]} {
    %c0 = arith.constant 0 : index
    %c0_0 = arith.constant 0 : index
    %c0_1 = arith.constant 0 : index
    %0 = vector.load %arg2[%c0, %c0_0, %c0_1] : memref<8x8x128xbf16, #tpu.memory_space<vmem>>, vector<8x8x128xbf16>
    %1 = vector.shape_cast %0 : vector<8x8x128xbf16> to vector<64x128xbf16>
    %c0_2 = arith.constant 0 : index
    %c0_3 = arith.constant 0 : index
    %2 = vector.load %arg3[%c0_2, %c0_3] : memref<128x512xbf16, #tpu.memory_space<vmem>>, vector<128x512xbf16>
    %cst = arith.constant dense<0.000000e+00> : vector<64x512xf32>
    %3 = tpu.matmul %1, %2, %cst {dimension_numbers = #tpu.dot_dimension_numbers<[1], [0], [0], [1], [0, 0, 1, 1], [], []>} : vector<64x128xbf16>, vector<128x512xbf16>, vector<64x512xf32> -> vector<64x512xf32>
    %c0_4 = arith.constant 0 : index
    %c0_5 = arith.constant 0 : index
    %4 = vector.load %arg5[%c0_4, %c0_5] : memref<1x512xf32, #tpu.memory_space<vmem>>, vector<1x512xf32>
    %5 = vector.broadcast %4 : vector<1x512xf32> to vector<64x512xf32>
    %6 = arith.addf %3, %5 : vector<64x512xf32>
    %7 = vector.shape_cast %6 : vector<64x512xf32> to vector<8x8x512xf32>
    %c0_6 = arith.constant 0 : index
    %c0_7 = arith.constant 0 : index
    %c0_8 = arith.constant 0 : index
    %8 = vector.load %arg12[%c0_6, %c0_7, %c0_8] : memref<8x8x512xf32, #tpu.memory_space<vmem>>, vector<8x8x512xf32>
    tpu.vector_store %arg12[%c0_6, %c0_7, %c0_8], %7 {strides = array<i32>} : memref<8x8x512xf32, #tpu.memory_space<vmem>>, vector<8x8x512xf32>,
    %c0_9 = arith.constant 0 : index
    %c0_10 = arith.constant 0 : index
    %9 = vector.load %arg1[%c0_9, %c0_10] : memref<8x256xbf16, #tpu.memory_space<vmem>>, vector<8x256xbf16>
    %c0_11 = arith.constant 0 : index
    %c0_12 = arith.constant 0 : index
    %10 = vector.load %arg6[%c0_11, %c0_12] : memref<256x128xbf16, #tpu.memory_space<vmem>>, vector<256x128xbf16>
    %cst_13 = arith.constant dense<0.000000e+00> : vector<8x128xf32>
    %11 = tpu.matmul %9, %10, %cst_13 {dimension_numbers = #tpu.dot_dimension_numbers<[1], [0], [0], [1], [0, 0, 1, 1], [], []>} : vector<8x256xbf16>, vector<256x128xbf16>, vector<8x128xf32> -> vector<8x128xf32>
    %c0_14 = arith.constant 0 : index
    %c0_15 = arith.constant 0 : index
    %12 = vector.load %arg8[%c0_14, %c0_15] : memref<1x128xf32, #tpu.memory_space<vmem>>, vector<1x128xf32>
    %13 = vector.broadcast %12 : vector<1x128xf32> to vector<8x128xf32>
    %14 = arith.addf %11, %13 : vector<8x128xf32>
    %cst_16 = arith.constant 0.000000e+00 : bf16
    %15 = vector.broadcast %cst_16 : bf16 to vector<8x128xbf16>
    %cst_17 = arith.constant 0.000000e+00 : f32
    %16 = vector.broadcast %cst_17 : f32 to vector<8x128xf32>
    %c0_i32 = arith.constant 0 : i32
    %c7_i32 = arith.constant 7 : i32
    %17 = arith.subi %c7_i32, %c0_i32 : i32
    %18 = arith.index_cast %17 : i32 to index
    %c0_18 = arith.constant 0 : index
    %c0_19 = arith.constant 0 : index
    %19 = vector.load %arg12[%18, %c0_18, %c0_19] : memref<8x8x512xf32, #tpu.memory_space<vmem>>, vector<1x8x512xf32>
    %20 = vector.shape_cast %19 : vector<1x8x512xf32> to vector<8x512xf32>
    %c0_20 = arith.constant 0 : index
    %c0_21 = arith.constant 0 : index
    %21 = vector.load %arg4[%c0_20, %c0_21] : memref<128x512xbf16, #tpu.memory_space<vmem>>, vector<128x512xbf16>
    %cst_22 = arith.constant dense<0.000000e+00> : vector<8x512xf32>
    %22 = tpu.matmul %15, %21, %cst_22 {dimension_numbers = #tpu.dot_dimension_numbers<[1], [0], [0], [1], [0, 0, 1, 1], [], []>} : vector<8x128xbf16>, vector<128x512xbf16>, vector<8x512xf32> -> vector<8x512xf32>
    %23 = arith.addf %20, %22 : vector<8x512xf32>
    %24 = vector.extract_strided_slice %23 {offsets = [0, 0], sizes = [8, 128], strides = [1, 1]} : vector<8x512xf32> to vector<8x128xf32>
    %25 = arith.negf %24 : vector<8x128xf32>
    %26 = math.exp %25 : vector<8x128xf32>
    %cst_23 = arith.constant 1.000000e+00 : f32
    %27 = vector.broadcast %cst_23 : f32 to vector<8x128xf32>
    %28 = arith.addf %27, %26 : vector<8x128xf32>
    %29 = arith.divf %27, %28 : vector<8x128xf32>
    %30 = vector.extract_strided_slice %23 {offsets = [0, 128], sizes = [8, 128], strides = [1, 1]} : vector<8x512xf32> to vector<8x128xf32>
    %31 = arith.negf %30 : vector<8x128xf32>
    %32 = math.exp %31 : vector<8x128xf32>
    %cst_24 = arith.constant 1.000000e+00 : f32
    %33 = vector.broadcast %cst_24 : f32 to vector<8x128xf32>
    %34 = arith.addf %33, %32 : vector<8x128xf32>
    %35 = arith.divf %33, %34 : vector<8x128xf32>
    %36 = vector.extract_strided_slice %23 {offsets = [0, 256], sizes = [8, 128], strides = [1, 1]} : vector<8x512xf32> to vector<8x128xf32>
    %37 = math.tanh %36 : vector<8x128xf32>
    %38 = vector.extract_strided_slice %23 {offsets = [0, 384], sizes = [8, 128], strides = [1, 1]} : vector<8x512xf32> to vector<8x128xf32>
    %39 = arith.negf %38 : vector<8x128xf32>
    %40 = math.exp %39 : vector<8x128xf32>
    %cst_25 = arith.constant 1.000000e+00 : f32
    %41 = vector.broadcast %cst_25 : f32 to vector<8x128xf32>
    %42 = arith.addf %41, %40 : vector<8x128xf32>
    %43 = arith.divf %41, %42 : vector<8x128xf32>
    %44 = arith.mulf %35, %16 : vector<8x128xf32>
    %45 = arith.mulf %29, %37 : vector<8x128xf32>
    %46 = arith.addf %44, %45 : vector<8x128xf32>
    %47 = math.tanh %46 : vector<8x128xf32>
    %48 = arith.mulf %43, %47 : vector<8x128xf32>
    %49 = arith.truncf %48 : vector<8x128xf32> to vector<8x128xbf16>
    %c1_i32 = arith.constant 1 : i32
    %c7_i32_26 = arith.constant 7 : i32
    %50 = arith.subi %c7_i32_26, %c1_i32 : i32
    %51 = arith.index_cast %50 : i32 to index
    %c0_27 = arith.constant 0 : index
    %c0_28 = arith.constant 0 : index
    %52 = vector.load %arg12[%51, %c0_27, %c0_28] : memref<8x8x512xf32, #tpu.memory_space<vmem>>, vector<1x8x512xf32>
    %53 = vector.shape_cast %52 : vector<1x8x512xf32> to vector<8x512xf32>
    %c0_29 = arith.constant 0 : index
    %c0_30 = arith.constant 0 : index
    %54 = vector.load %arg4[%c0_29, %c0_30] : memref<128x512xbf16, #tpu.memory_space<vmem>>, vector<128x512xbf16>
    %cst_31 = arith.constant dense<0.000000e+00> : vector<8x512xf32>
    %55 = tpu.matmul %49, %54, %cst_31 {dimension_numbers = #tpu.dot_dimension_numbers<[1], [0], [0], [1], [0, 0, 1, 1], [], []>} : vector<8x128xbf16>, vector<128x512xbf16>, vector<8x512xf32> -> vector<8x512xf32>
    %56 = arith.addf %53, %55 : vector<8x512xf32>
    %57 = vector.extract_strided_slice %56 {offsets = [0, 0], sizes = [8, 128], strides = [1, 1]} : vector<8x512xf32> to vector<8x128xf32>
    %58 = arith.negf %57 : vector<8x128xf32>
    %59 = math.exp %58 : vector<8x128xf32>
    %cst_32 = arith.constant 1.000000e+00 : f32
    %60 = vector.broadcast %cst_32 : f32 to vector<8x128xf32>
    %61 = arith.addf %60, %59 : vector<8x128xf32>
    %62 = arith.divf %60, %61 : vector<8x128xf32>
    %63 = vector.extract_strided_slice %56 {offsets = [0, 128], sizes = [8, 128], strides = [1, 1]} : vector<8x512xf32> to vector<8x128xf32>
    %64 = arith.negf %63 : vector<8x128xf32>
    %65 = math.exp %64 : vector<8x128xf32>
    %cst_33 = arith.constant 1.000000e+00 : f32
    %66 = vector.broadcast %cst_33 : f32 to vector<8x128xf32>
    %67 = arith.addf %66, %65 : vector<8x128xf32>
    %68 = arith.divf %66, %67 : vector<8x128xf32>
    %69 = vector.extract_strided_slice %56 {offsets = [0, 256], sizes = [8, 128], strides = [1, 1]} : vector<8x512xf32> to vector<8x128xf32>
    %70 = math.tanh %69 : vector<8x128xf32>
    %71 = vector.extract_strided_slice %56 {offsets = [0, 384], sizes = [8, 128], strides = [1, 1]} : vector<8x512xf32> to vector<8x128xf32>
    %72 = arith.negf %71 : vector<8x128xf32>
    %73 = math.exp %72 : vector<8x128xf32>
    %cst_34 = arith.constant 1.000000e+00 : f32
    %74 = vector.broadcast %cst_34 : f32 to vector<8x128xf32>
    %75 = arith.addf %74, %73 : vector<8x128xf32>
    %76 = arith.divf %74, %75 : vector<8x128xf32>
    %77 = arith.mulf %68, %46 : vector<8x128xf32>
    %78 = arith.mulf %62, %70 : vector<8x128xf32>
    %79 = arith.addf %77, %78 : vector<8x128xf32>
    %80 = math.tanh %79 : vector<8x128xf32>
    %81 = arith.mulf %76, %80 : vector<8x128xf32>
    %82 = arith.truncf %81 : vector<8x128xf32> to vector<8x128xbf16>
    %c2_i32 = arith.constant 2 : i32
    %c7_i32_35 = arith.constant 7 : i32
    %83 = arith.subi %c7_i32_35, %c2_i32 : i32
    %84 = arith.index_cast %83 : i32 to index
    %c0_36 = arith.constant 0 : index
    %c0_37 = arith.constant 0 : index
    %85 = vector.load %arg12[%84, %c0_36, %c0_37] : memref<8x8x512xf32, #tpu.memory_space<vmem>>, vector<1x8x512xf32>
    %86 = vector.shape_cast %85 : vector<1x8x512xf32> to vector<8x512xf32>
    %c0_38 = arith.constant 0 : index
    %c0_39 = arith.constant 0 : index
    %87 = vector.load %arg4[%c0_38, %c0_39] : memref<128x512xbf16, #tpu.memory_space<vmem>>, vector<128x512xbf16>
    %cst_40 = arith.constant dense<0.000000e+00> : vector<8x512xf32>
    %88 = tpu.matmul %82, %87, %cst_40 {dimension_numbers = #tpu.dot_dimension_numbers<[1], [0], [0], [1], [0, 0, 1, 1], [], []>} : vector<8x128xbf16>, vector<128x512xbf16>, vector<8x512xf32> -> vector<8x512xf32>
    %89 = arith.addf %86, %88 : vector<8x512xf32>
    %90 = vector.extract_strided_slice %89 {offsets = [0, 0], sizes = [8, 128], strides = [1, 1]} : vector<8x512xf32> to vector<8x128xf32>
    %91 = arith.negf %90 : vector<8x128xf32>
    %92 = math.exp %91 : vector<8x128xf32>
    %cst_41 = arith.constant 1.000000e+00 : f32
    %93 = vector.broadcast %cst_41 : f32 to vector<8x128xf32>
    %94 = arith.addf %93, %92 : vector<8x128xf32>
    %95 = arith.divf %93, %94 : vector<8x128xf32>
    %96 = vector.extract_strided_slice %89 {offsets = [0, 128], sizes = [8, 128], strides = [1, 1]} : vector<8x512xf32> to vector<8x128xf32>
    %97 = arith.negf %96 : vector<8x128xf32>
    %98 = math.exp %97 : vector<8x128xf32>
    %cst_42 = arith.constant 1.000000e+00 : f32
    %99 = vector.broadcast %cst_42 : f32 to vector<8x128xf32>
    %100 = arith.addf %99, %98 : vector<8x128xf32>
    %101 = arith.divf %99, %100 : vector<8x128xf32>
    %102 = vector.extract_strided_slice %89 {offsets = [0, 256], sizes = [8, 128], strides = [1, 1]} : vector<8x512xf32> to vector<8x128xf32>
    %103 = math.tanh %102 : vector<8x128xf32>
    %104 = vector.extract_strided_slice %89 {offsets = [0, 384], sizes = [8, 128], strides = [1, 1]} : vector<8x512xf32> to vector<8x128xf32>
    %105 = arith.negf %104 : vector<8x128xf32>
    %106 = math.exp %105 : vector<8x128xf32>
    %cst_43 = arith.constant 1.000000e+00 : f32
    %107 = vector.broadcast %cst_43 : f32 to vector<8x128xf32>
    %108 = arith.addf %107, %106 : vector<8x128xf32>
    %109 = arith.divf %107, %108 : vector<8x128xf32>
    %110 = arith.mulf %101, %79 : vector<8x128xf32>
    %111 = arith.mulf %95, %103 : vector<8x128xf32>
    %112 = arith.addf %110, %111 : vector<8x128xf32>
    %113 = math.tanh %112 : vector<8x128xf32>
    %114 = arith.mulf %109, %113 : vector<8x128xf32>
    %115 = arith.truncf %114 : vector<8x128xf32> to vector<8x128xbf16>
    %c3_i32 = arith.constant 3 : i32
    %c7_i32_44 = arith.constant 7 : i32
    %116 = arith.subi %c7_i32_44, %c3_i32 : i32
    %117 = arith.index_cast %116 : i32 to index
    %c0_45 = arith.constant 0 : index
    %c0_46 = arith.constant 0 : index
    %118 = vector.load %arg12[%117, %c0_45, %c0_46] : memref<8x8x512xf32, #tpu.memory_space<vmem>>, vector<1x8x512xf32>
    %119 = vector.shape_cast %118 : vector<1x8x512xf32> to vector<8x512xf32>
    %c0_47 = arith.constant 0 : index
    %c0_48 = arith.constant 0 : index
    %120 = vector.load %arg4[%c0_47, %c0_48] : memref<128x512xbf16, #tpu.memory_space<vmem>>, vector<128x512xbf16>
    %cst_49 = arith.constant dense<0.000000e+00> : vector<8x512xf32>
    %121 = tpu.matmul %115, %120, %cst_49 {dimension_numbers = #tpu.dot_dimension_numbers<[1], [0], [0], [1], [0, 0, 1, 1], [], []>} : vector<8x128xbf16>, vector<128x512xbf16>, vector<8x512xf32> -> vector<8x512xf32>
    %122 = arith.addf %119, %121 : vector<8x512xf32>
    %123 = vector.extract_strided_slice %122 {offsets = [0, 0], sizes = [8, 128], strides = [1, 1]} : vector<8x512xf32> to vector<8x128xf32>
    %124 = arith.negf %123 : vector<8x128xf32>
    %125 = math.exp %124 : vector<8x128xf32>
    %cst_50 = arith.constant 1.000000e+00 : f32
    %126 = vector.broadcast %cst_50 : f32 to vector<8x128xf32>
    %127 = arith.addf %126, %125 : vector<8x128xf32>
    %128 = arith.divf %126, %127 : vector<8x128xf32>
    %129 = vector.extract_strided_slice %122 {offsets = [0, 128], sizes = [8, 128], strides = [1, 1]} : vector<8x512xf32> to vector<8x128xf32>
    %130 = arith.negf %129 : vector<8x128xf32>
    %131 = math.exp %130 : vector<8x128xf32>
    %cst_51 = arith.constant 1.000000e+00 : f32
    %132 = vector.broadcast %cst_51 : f32 to vector<8x128xf32>
    %133 = arith.addf %132, %131 : vector<8x128xf32>
    %134 = arith.divf %132, %133 : vector<8x128xf32>
    %135 = vector.extract_strided_slice %122 {offsets = [0, 256], sizes = [8, 128], strides = [1, 1]} : vector<8x512xf32> to vector<8x128xf32>
    %136 = math.tanh %135 : vector<8x128xf32>
    %137 = vector.extract_strided_slice %122 {offsets = [0, 384], sizes = [8, 128], strides = [1, 1]} : vector<8x512xf32> to vector<8x128xf32>
    %138 = arith.negf %137 : vector<8x128xf32>
    %139 = math.exp %138 : vector<8x128xf32>
    %cst_52 = arith.constant 1.000000e+00 : f32
    %140 = vector.broadcast %cst_52 : f32 to vector<8x128xf32>
    %141 = arith.addf %140, %139 : vector<8x128xf32>
    %142 = arith.divf %140, %141 : vector<8x128xf32>
    %143 = arith.mulf %134, %112 : vector<8x128xf32>
    %144 = arith.mulf %128, %136 : vector<8x128xf32>
    %145 = arith.addf %143, %144 : vector<8x128xf32>
    %146 = math.tanh %145 : vector<8x128xf32>
    %147 = arith.mulf %142, %146 : vector<8x128xf32>
    %148 = arith.truncf %147 : vector<8x128xf32> to vector<8x128xbf16>
    %c4_i32 = arith.constant 4 : i32
    %c7_i32_53 = arith.constant 7 : i32
    %149 = arith.subi %c7_i32_53, %c4_i32 : i32
    %150 = arith.index_cast %149 : i32 to index
    %c0_54 = arith.constant 0 : index
    %c0_55 = arith.constant 0 : index
    %151 = vector.load %arg12[%150, %c0_54, %c0_55] : memref<8x8x512xf32, #tpu.memory_space<vmem>>, vector<1x8x512xf32>
    %152 = vector.shape_cast %151 : vector<1x8x512xf32> to vector<8x512xf32>
    %c0_56 = arith.constant 0 : index
    %c0_57 = arith.constant 0 : index
    %153 = vector.load %arg4[%c0_56, %c0_57] : memref<128x512xbf16, #tpu.memory_space<vmem>>, vector<128x512xbf16>
    %cst_58 = arith.constant dense<0.000000e+00> : vector<8x512xf32>
    %154 = tpu.matmul %148, %153, %cst_58 {dimension_numbers = #tpu.dot_dimension_numbers<[1], [0], [0], [1], [0, 0, 1, 1], [], []>} : vector<8x128xbf16>, vector<128x512xbf16>, vector<8x512xf32> -> vector<8x512xf32>
    %155 = arith.addf %152, %154 : vector<8x512xf32>
    %156 = vector.extract_strided_slice %155 {offsets = [0, 0], sizes = [8, 128], strides = [1, 1]} : vector<8x512xf32> to vector<8x128xf32>
    %157 = arith.negf %156 : vector<8x128xf32>
    %158 = math.exp %157 : vector<8x128xf32>
    %cst_59 = arith.constant 1.000000e+00 : f32
    %159 = vector.broadcast %cst_59 : f32 to vector<8x128xf32>
    %160 = arith.addf %159, %158 : vector<8x128xf32>
    %161 = arith.divf %159, %160 : vector<8x128xf32>
    %162 = vector.extract_strided_slice %155 {offsets = [0, 128], sizes = [8, 128], strides = [1, 1]} : vector<8x512xf32> to vector<8x128xf32>
    %163 = arith.negf %162 : vector<8x128xf32>
    %164 = math.exp %163 : vector<8x128xf32>
    %cst_60 = arith.constant 1.000000e+00 : f32
    %165 = vector.broadcast %cst_60 : f32 to vector<8x128xf32>
    %166 = arith.addf %165, %164 : vector<8x128xf32>
    %167 = arith.divf %165, %166 : vector<8x128xf32>
    %168 = vector.extract_strided_slice %155 {offsets = [0, 256], sizes = [8, 128], strides = [1, 1]} : vector<8x512xf32> to vector<8x128xf32>
    %169 = math.tanh %168 : vector<8x128xf32>
    %170 = vector.extract_strided_slice %155 {offsets = [0, 384], sizes = [8, 128], strides = [1, 1]} : vector<8x512xf32> to vector<8x128xf32>
    %171 = arith.negf %170 : vector<8x128xf32>
    %172 = math.exp %171 : vector<8x128xf32>
    %cst_61 = arith.constant 1.000000e+00 : f32
    %173 = vector.broadcast %cst_61 : f32 to vector<8x128xf32>
    %174 = arith.addf %173, %172 : vector<8x128xf32>
    %175 = arith.divf %173, %174 : vector<8x128xf32>
    %176 = arith.mulf %167, %145 : vector<8x128xf32>
    %177 = arith.mulf %161, %169 : vector<8x128xf32>
    %178 = arith.addf %176, %177 : vector<8x128xf32>
    %179 = math.tanh %178 : vector<8x128xf32>
    %180 = arith.mulf %175, %179 : vector<8x128xf32>
    %181 = arith.truncf %180 : vector<8x128xf32> to vector<8x128xbf16>
    %c5_i32 = arith.constant 5 : i32
    %c7_i32_62 = arith.constant 7 : i32
    %182 = arith.subi %c7_i32_62, %c5_i32 : i32
    %183 = arith.index_cast %182 : i32 to index
    %c0_63 = arith.constant 0 : index
    %c0_64 = arith.constant 0 : index
    %184 = vector.load %arg12[%183, %c0_63, %c0_64] : memref<8x8x512xf32, #tpu.memory_space<vmem>>, vector<1x8x512xf32>
    %185 = vector.shape_cast %184 : vector<1x8x512xf32> to vector<8x512xf32>
    %c0_65 = arith.constant 0 : index
    %c0_66 = arith.constant 0 : index
    %186 = vector.load %arg4[%c0_65, %c0_66] : memref<128x512xbf16, #tpu.memory_space<vmem>>, vector<128x512xbf16>
    %cst_67 = arith.constant dense<0.000000e+00> : vector<8x512xf32>
    %187 = tpu.matmul %181, %186, %cst_67 {dimension_numbers = #tpu.dot_dimension_numbers<[1], [0], [0], [1], [0, 0, 1, 1], [], []>} : vector<8x128xbf16>, vector<128x512xbf16>, vector<8x512xf32> -> vector<8x512xf32>
    %188 = arith.addf %185, %187 : vector<8x512xf32>
    %189 = vector.extract_strided_slice %188 {offsets = [0, 0], sizes = [8, 128], strides = [1, 1]} : vector<8x512xf32> to vector<8x128xf32>
    %190 = arith.negf %189 : vector<8x128xf32>
    %191 = math.exp %190 : vector<8x128xf32>
    %cst_68 = arith.constant 1.000000e+00 : f32
    %192 = vector.broadcast %cst_68 : f32 to vector<8x128xf32>
    %193 = arith.addf %192, %191 : vector<8x128xf32>
    %194 = arith.divf %192, %193 : vector<8x128xf32>
    %195 = vector.extract_strided_slice %188 {offsets = [0, 128], sizes = [8, 128], strides = [1, 1]} : vector<8x512xf32> to vector<8x128xf32>
    %196 = arith.negf %195 : vector<8x128xf32>
    %197 = math.exp %196 : vector<8x128xf32>
    %cst_69 = arith.constant 1.000000e+00 : f32
    %198 = vector.broadcast %cst_69 : f32 to vector<8x128xf32>
    %199 = arith.addf %198, %197 : vector<8x128xf32>
    %200 = arith.divf %198, %199 : vector<8x128xf32>
    %201 = vector.extract_strided_slice %188 {offsets = [0, 256], sizes = [8, 128], strides = [1, 1]} : vector<8x512xf32> to vector<8x128xf32>
    %202 = math.tanh %201 : vector<8x128xf32>
    %203 = vector.extract_strided_slice %188 {offsets = [0, 384], sizes = [8, 128], strides = [1, 1]} : vector<8x512xf32> to vector<8x128xf32>
    %204 = arith.negf %203 : vector<8x128xf32>
    %205 = math.exp %204 : vector<8x128xf32>
    %cst_70 = arith.constant 1.000000e+00 : f32
    %206 = vector.broadcast %cst_70 : f32 to vector<8x128xf32>
    %207 = arith.addf %206, %205 : vector<8x128xf32>
    %208 = arith.divf %206, %207 : vector<8x128xf32>
    %209 = arith.mulf %200, %178 : vector<8x128xf32>
    %210 = arith.mulf %194, %202 : vector<8x128xf32>
    %211 = arith.addf %209, %210 : vector<8x128xf32>
    %212 = math.tanh %211 : vector<8x128xf32>
    %213 = arith.mulf %208, %212 : vector<8x128xf32>
    %214 = arith.truncf %213 : vector<8x128xf32> to vector<8x128xbf16>
    %c6_i32 = arith.constant 6 : i32
    %c7_i32_71 = arith.constant 7 : i32
    %215 = arith.subi %c7_i32_71, %c6_i32 : i32
    %216 = arith.index_cast %215 : i32 to index
    %c0_72 = arith.constant 0 : index
    %c0_73 = arith.constant 0 : index
    %217 = vector.load %arg12[%216, %c0_72, %c0_73] : memref<8x8x512xf32, #tpu.memory_space<vmem>>, vector<1x8x512xf32>
    %218 = vector.shape_cast %217 : vector<1x8x512xf32> to vector<8x512xf32>
    %c0_74 = arith.constant 0 : index
    %c0_75 = arith.constant 0 : index
    %219 = vector.load %arg4[%c0_74, %c0_75] : memref<128x512xbf16, #tpu.memory_space<vmem>>, vector<128x512xbf16>
    %cst_76 = arith.constant dense<0.000000e+00> : vector<8x512xf32>
    %220 = tpu.matmul %214, %219, %cst_76 {dimension_numbers = #tpu.dot_dimension_numbers<[1], [0], [0], [1], [0, 0, 1, 1], [], []>} : vector<8x128xbf16>, vector<128x512xbf16>, vector<8x512xf32> -> vector<8x512xf32>
    %221 = arith.addf %218, %220 : vector<8x512xf32>
    %222 = vector.extract_strided_slice %221 {offsets = [0, 0], sizes = [8, 128], strides = [1, 1]} : vector<8x512xf32> to vector<8x128xf32>
    %223 = arith.negf %222 : vector<8x128xf32>
    %224 = math.exp %223 : vector<8x128xf32>
    %cst_77 = arith.constant 1.000000e+00 : f32
    %225 = vector.broadcast %cst_77 : f32 to vector<8x128xf32>
    %226 = arith.addf %225, %224 : vector<8x128xf32>
    %227 = arith.divf %225, %226 : vector<8x128xf32>
    %228 = vector.extract_strided_slice %221 {offsets = [0, 128], sizes = [8, 128], strides = [1, 1]} : vector<8x512xf32> to vector<8x128xf32>
    %229 = arith.negf %228 : vector<8x128xf32>
    %230 = math.exp %229 : vector<8x128xf32>
    %cst_78 = arith.constant 1.000000e+00 : f32
    %231 = vector.broadcast %cst_78 : f32 to vector<8x128xf32>
    %232 = arith.addf %231, %230 : vector<8x128xf32>
    %233 = arith.divf %231, %232 : vector<8x128xf32>
    %234 = vector.extract_strided_slice %221 {offsets = [0, 256], sizes = [8, 128], strides = [1, 1]} : vector<8x512xf32> to vector<8x128xf32>
    %235 = math.tanh %234 : vector<8x128xf32>
    %236 = vector.extract_strided_slice %221 {offsets = [0, 384], sizes = [8, 128], strides = [1, 1]} : vector<8x512xf32> to vector<8x128xf32>
    %237 = arith.negf %236 : vector<8x128xf32>
    %238 = math.exp %237 : vector<8x128xf32>
    %cst_79 = arith.constant 1.000000e+00 : f32
    %239 = vector.broadcast %cst_79 : f32 to vector<8x128xf32>
    %240 = arith.addf %239, %238 : vector<8x128xf32>
    %241 = arith.divf %239, %240 : vector<8x128xf32>
    %242 = arith.mulf %233, %211 : vector<8x128xf32>
    %243 = arith.mulf %227, %235 : vector<8x128xf32>
    %244 = arith.addf %242, %243 : vector<8x128xf32>
    %245 = math.tanh %244 : vector<8x128xf32>
    %246 = arith.mulf %241, %245 : vector<8x128xf32>
    %247 = arith.truncf %246 : vector<8x128xf32> to vector<8x128xbf16>
    %c7_i32_80 = arith.constant 7 : i32
    %c7_i32_81 = arith.constant 7 : i32
    %248 = arith.subi %c7_i32_81, %c7_i32_80 : i32
    %249 = arith.index_cast %248 : i32 to index
    %c0_82 = arith.constant 0 : index
    %c0_83 = arith.constant 0 : index
    %250 = vector.load %arg12[%249, %c0_82, %c0_83] : memref<8x8x512xf32, #tpu.memory_space<vmem>>, vector<1x8x512xf32>
    %251 = vector.shape_cast %250 : vector<1x8x512xf32> to vector<8x512xf32>
    %c0_84 = arith.constant 0 : index
    %c0_85 = arith.constant 0 : index
    %252 = vector.load %arg4[%c0_84, %c0_85] : memref<128x512xbf16, #tpu.memory_space<vmem>>, vector<128x512xbf16>
    %cst_86 = arith.constant dense<0.000000e+00> : vector<8x512xf32>
    %253 = tpu.matmul %247, %252, %cst_86 {dimension_numbers = #tpu.dot_dimension_numbers<[1], [0], [0], [1], [0, 0, 1, 1], [], []>} : vector<8x128xbf16>, vector<128x512xbf16>, vector<8x512xf32> -> vector<8x512xf32>
    %254 = arith.addf %251, %253 : vector<8x512xf32>
    %255 = vector.extract_strided_slice %254 {offsets = [0, 0], sizes = [8, 128], strides = [1, 1]} : vector<8x512xf32> to vector<8x128xf32>
    %256 = arith.negf %255 : vector<8x128xf32>
    %257 = math.exp %256 : vector<8x128xf32>
    %cst_87 = arith.constant 1.000000e+00 : f32
    %258 = vector.broadcast %cst_87 : f32 to vector<8x128xf32>
    %259 = arith.addf %258, %257 : vector<8x128xf32>
    %260 = arith.divf %258, %259 : vector<8x128xf32>
    %261 = vector.extract_strided_slice %254 {offsets = [0, 128], sizes = [8, 128], strides = [1, 1]} : vector<8x512xf32> to vector<8x128xf32>
    %262 = arith.negf %261 : vector<8x128xf32>
    %263 = math.exp %262 : vector<8x128xf32>
    %cst_88 = arith.constant 1.000000e+00 : f32
    %264 = vector.broadcast %cst_88 : f32 to vector<8x128xf32>
    %265 = arith.addf %264, %263 : vector<8x128xf32>
    %266 = arith.divf %264, %265 : vector<8x128xf32>
    %267 = vector.extract_strided_slice %254 {offsets = [0, 256], sizes = [8, 128], strides = [1, 1]} : vector<8x512xf32> to vector<8x128xf32>
    %268 = math.tanh %267 : vector<8x128xf32>
    %269 = vector.extract_strided_slice %254 {offsets = [0, 384], sizes = [8, 128], strides = [1, 1]} : vector<8x512xf32> to vector<8x128xf32>
    %270 = arith.negf %269 : vector<8x128xf32>
    %271 = math.exp %270 : vector<8x128xf32>
    %cst_89 = arith.constant 1.000000e+00 : f32
    %272 = vector.broadcast %cst_89 : f32 to vector<8x128xf32>
    %273 = arith.addf %272, %271 : vector<8x128xf32>
    %274 = arith.divf %272, %273 : vector<8x128xf32>
    %275 = arith.mulf %266, %244 : vector<8x128xf32>
    %276 = arith.mulf %260, %268 : vector<8x128xf32>
    %277 = arith.addf %275, %276 : vector<8x128xf32>
    %278 = math.tanh %277 : vector<8x128xf32>
    %279 = arith.mulf %274, %278 : vector<8x128xf32>
    %280 = arith.truncf %279 : vector<8x128xf32> to vector<8x128xbf16>
    %c8_i32 = arith.constant 8 : i32
    %c0_90 = arith.constant 0 : index
    %c0_91 = arith.constant 0 : index
    %281 = vector.load %arg7[%c0_90, %c0_91] : memref<128x128xbf16, #tpu.memory_space<vmem>>, vector<128x128xbf16>
    %cst_92 = arith.constant dense<0.000000e+00> : vector<8x128xf32>
    %282 = tpu.matmul %280, %281, %cst_92 {dimension_numbers = #tpu.dot_dimension_numbers<[1], [0], [0], [1], [0, 0, 1, 1], [], []>} : vector<8x128xbf16>, vector<128x128xbf16>, vector<8x128xf32> -> vector<8x128xf32>
    %283 = arith.addf %14, %282 : vector<8x128xf32>
    %cst_93 = arith.constant 0.000000e+00 : f32
    %284 = vector.broadcast %cst_93 : f32 to vector<8x128xf32>
    %285 = arith.maximumf %283, %284 : vector<8x128xf32>
    %c0_94 = arith.constant 0 : index
    %c0_95 = arith.constant 0 : index
    %286 = vector.load %arg9[%c0_94, %c0_95] : memref<1x128xf32, #tpu.memory_space<vmem>>, vector<1x128xf32>
    %287 = vector.broadcast %286 : vector<1x128xf32> to vector<8x128xf32>
    %288 = arith.mulf %285, %287 : vector<8x128xf32>
    %cst_96 = arith.constant dense<0.000000e+00> : vector<8xf32>
    %289 = vector.multi_reduction <add>, %288, %cst_96 [1] : vector<8x128xf32> to vector<8xf32>
    %290 = vector.shape_cast %289 : vector<8xf32> to vector<8x1xf32>
    %c0_97 = arith.constant 0 : index
    %c0_98 = arith.constant 0 : index
    %291 = vector.load %arg10[%c0_97, %c0_98] : memref<1x1xf32, #tpu.memory_space<vmem>>, vector<1x1xf32>
    %292 = vector.broadcast %291 : vector<1x1xf32> to vector<8x1xf32>
    %293 = arith.addf %290, %292 : vector<8x1xf32>
    %294 = arith.negf %293 : vector<8x1xf32>
    %295 = math.exp %294 : vector<8x1xf32>
    %cst_99 = arith.constant 1.000000e+00 : f32
    %296 = vector.broadcast %cst_99 : f32 to vector<8x1xf32>
    %297 = arith.addf %296, %295 : vector<8x1xf32>
    %298 = arith.divf %296, %297 : vector<8x1xf32>
    %299 = vector.shape_cast %298 : vector<8x1xf32> to vector<8x1xf32>
    %300 = vector.broadcast %299 : vector<8x1xf32> to vector<8x128xf32>
    %c0_100 = arith.constant 0 : index
    %c0_101 = arith.constant 0 : index
    %301 = vector.load %arg11[%c0_100, %c0_101] : memref<8x128xf32, #tpu.memory_space<vmem>>, vector<8x128xf32>
    tpu.vector_store %arg11[%c0_100, %c0_101], %300 {strides = array<i32>} : memref<8x128xf32, #tpu.memory_space<vmem>>, vector<8x128xf32>,
    return
  }
  func.func @transform_0(%arg0: i32) -> (i32, i32) {
    %c0_i32 = arith.constant 0 : i32
    %c0_i32_0 = arith.constant 0 : i32
    return %arg0, %c0_i32 : i32, i32
  }
  func.func @transform_1(%arg0: i32) -> (i32, i32, i32) {
    %c0_i32 = arith.constant 0 : i32
    %c0_i32_0 = arith.constant 0 : i32
    %c0_i32_1 = arith.constant 0 : i32
    return %c0_i32, %arg0, %c0_i32_0 : i32, i32, i32
  }
  func.func @transform_2(%arg0: i32) -> (i32, i32) {
    %c0_i32 = arith.constant 0 : i32
    %c0_i32_0 = arith.constant 0 : i32
    %c0_i32_1 = arith.constant 0 : i32
    return %c0_i32, %c0_i32_0 : i32, i32
  }
  func.func @transform_3(%arg0: i32) -> (i32, i32) {
    %c0_i32 = arith.constant 0 : i32
    %c0_i32_0 = arith.constant 0 : i32
    %c0_i32_1 = arith.constant 0 : i32
    return %c0_i32, %c0_i32_0 : i32, i32
  }
  func.func @transform_4(%arg0: i32) -> (i32, i32) {
    %c0_i32 = arith.constant 0 : i32
    %c0_i32_0 = arith.constant 0 : i32
    %c0_i32_1 = arith.constant 0 : i32
    return %c0_i32, %c0_i32_0 : i32, i32
  }
  func.func @transform_5(%arg0: i32) -> (i32, i32) {
    %c0_i32 = arith.constant 0 : i32
    %c0_i32_0 = arith.constant 0 : i32
    %c0_i32_1 = arith.constant 0 : i32
    return %c0_i32, %c0_i32_0 : i32, i32
  }
  func.func @transform_6(%arg0: i32) -> (i32, i32) {
    %c0_i32 = arith.constant 0 : i32
    %c0_i32_0 = arith.constant 0 : i32
    %c0_i32_1 = arith.constant 0 : i32
    return %c0_i32, %c0_i32_0 : i32, i32
  }
  func.func @transform_7(%arg0: i32) -> (i32, i32) {
    %c0_i32 = arith.constant 0 : i32
    %c0_i32_0 = arith.constant 0 : i32
    %c0_i32_1 = arith.constant 0 : i32
    return %c0_i32, %c0_i32_0 : i32, i32
  }
  func.func @transform_8(%arg0: i32) -> (i32, i32) {
    %c0_i32 = arith.constant 0 : i32
    %c0_i32_0 = arith.constant 0 : i32
    %c0_i32_1 = arith.constant 0 : i32
    return %c0_i32, %c0_i32_0 : i32, i32
  }
  func.func @transform_9(%arg0: i32) -> (i32, i32) {
    %c0_i32 = arith.constant 0 : i32
    %c0_i32_0 = arith.constant 0 : i32
    %c0_i32_1 = arith.constant 0 : i32
    return %c0_i32, %c0_i32_0 : i32, i32
  }
  func.func @transform_10(%arg0: i32) -> (i32, i32) {
    %c0_i32 = arith.constant 0 : i32
    %c0_i32_0 = arith.constant 0 : i32
    return %arg0, %c0_i32 : i32, i32
  }
}

</mosaic_0001>

<bundles_post_ra>
// kernel: reward_forward.1
= control target key start
LH: loop header
LB: loop body
LE: loop exit
PB: predicated region body
PF: predicated region fallthrough
CT: control target
= control target key end

     0   :  { %s4221_s0 = inlined_call_operand.vmem [shape: bf16[16,256], index: 0, kind: input, shape index: {}]   ;;  %s4222_s1 = inlined_call_operand.vmem [shape: bf16[8,16,128], index: 1, kind: input, shape index: {}]   ;;  %s4223_s2 = inlined_call_operand.vmem [shape: bf16[128,512], index: 2, kind: input, shape index: {}]   ;;  %s4224_s3 = inlined_call_operand.hbm [shape: bf16[128,512], index: 3, kind: input, shape index: {}]   ;;  %s4225_s4 = inlined_call_operand.hbm [shape: f32[1,512], index: 4, kind: input, shape index: {}]   ;;  %s4226_s5 = inlined_call_operand.hbm [shape: bf16[256,128], index: 5, kind: input, shape index: {}]   ;;  %s4227_s6 = inlined_call_operand.hbm [shape: bf16[128,128], index: 6, kind: input, shape index: {}]   ;;  %s4228_s7 = inlined_call_operand.vmem [shape: f32[1,128], index: 7, kind: input, shape index: {}]   ;;  %s4229_s8 = inlined_call_operand.vmem [shape: f32[1,128], index: 8, kind: input, shape index: {}]   ;;  %s4230_s9 = inlined_call_operand.<no memory space> [shape: f32[1,1], index: 9, kind: input, shape index: {}]   ;;  %s4231_s10 = inlined_call_operand.vmem [shape: f32[16,128], index: 10, kind: output, shape index: {}]  }
   0x1   :  { %4237 = sst [smem:[#allocation42_spill]] %s4224_s3  ;;  %v15_v0 = vstv %s4230_s9 }
   0x2   :  { %4238 = sst [smem:[#allocation43_spill]] %s4225_s4  ;;  %16 = vst [vmem:[#allocation3] sm:$0x1] %v15_v0 }
   0x3   :  { %17 = vsyncpa [#allocation6], 0 }
   0x4   :  { %18 = vsyncpa [#allocation8], 0 }
   0x5   :  { %19 = vsyncpa [#allocation11], 0  ;;  %s3420_s15 = smov 0   ;;  %s3422_s16 = smov 0  }
   0x6   :  { %s3424_s17 = smov 0  }
   0x7 LB: > { %s3436_s9 = sadd.s32 4294967295, %s3351_s17   ;;  %s3439_s18 = sadd.s32 1, %s3351_s17   ;;  %s3351_s17 = sphi %s3424_s17, %s4296_s17   ;;  %s3347_s16 = sphi %s3422_s16, %s4299_s16   ;;  %s3343_s15 = sphi %s3420_s15, %s4298_s15  }
   0x8   : > { %4239 = sst [smem:[#allocation15_spill]] %s3439_s18  ;;  %s55_s19 = ssub.s32 %s3351_s17, %s3439_s18 }
   0x9   : > { %s58_s20 = sadd.s32 1, %s3347_s16  ;;  %p56_p0 = scmp.eq.s32.totalorder %s55_s19, 0 }
   0xa   : > { %p65_p1 = scmp.ne.s32.totalorder %s3347_s16, %s3343_s15  ;;  %p66_p2 = scmp.eq.s32.totalorder %s3351_s17, 0 }
   0xb   : > { %p2486_p3 = scmp.ge.s32.totalorder %s3351_s17, 1  ;;  %p276_p5 = scmp.lt.s32.totalorder %s3351_s17, 3 }
   0xc   : > { %s3449_s21 = scalar_select %p56_p0, %s3347_s16, %s58_s20  }
   0xd   : > { %p3451_p4 = por %p66_p2, %p65_p1  ;;  %p3020_p6 = scmp.eq.s32.totalorder %s3436_s9, 0 }
   0xe   : > { %4240 = sst [smem:[#allocation16_spill]] %s3449_s21  ;;  %p3457_p7 = pnand %p2486_p3, %p276_p5 }
   0xf   : > { %s4243_s4 = sld [smem:[#allocation43_spill]]  ;;  %s3353_s27 = smov [#allocation7]  }
  0x10   : > { %p3007_p8 = pneg %p3457_p7  ;;  %s307_s28 = sshll.u32 %s3353_s27, 4  ;;  %s308_s28 = int_to_ptr.vmem [resolvable:$true] %s307_s28 }
  0x11   : > { %s4244_s3 = sld [smem:[#allocation42_spill]]  ;;  %s3354_s13 = smov [#allocation5]  }
  0x12   : > { %p3471_p9 = pnand %p3020_p6, %p3007_p8  ;;  %s292_s14 = sshll.u32 %s3354_s13, 4  ;;  %s293_s14 = int_to_ptr.vmem [resolvable:$true] %s292_s14 }
  0x13   : > { %s3355_s19 = smov 256   ;;  %s3356_s20 = smov 16  }
  0x14   : > { %s316_s27 = sshll.u32 %s4226_s5, 4  ;;  %s3357_s29 = smov [#allocation9]   ;;  %s317_s27 = int_to_ptr.hbm [resolvable:$true] %s316_s27 }
  0x15   : > { %s305_s26 = sshll.u32 %s4243_s4, 4  ;;  %s318_s30 = sshll.u32 %s3357_s29, 4  ;;  %s306_s26 = int_to_ptr.hbm [resolvable:$true] %s305_s26  ;;  %s319_s30 = int_to_ptr.vmem [resolvable:$true] %s318_s30 }
  0x16   : > { %3013 = dma.hbm_to_vmem [thread:$0]  (!%p3471_p9), %s306_s26, 64, %s308_s28, [#allocation8]  }
  0x17   : > { %s290_s11 = sshll.u32 %s4244_s3, 4  ;;  %s330_s13 = sshll.u32 %s4227_s6, 4  ;;  %s291_s11 = int_to_ptr.hbm [resolvable:$true] %s290_s11  ;;  %s331_s13 = int_to_ptr.hbm [resolvable:$true] %s330_s13 }
  0x18   : > { %3010 = dma.hbm_to_vmem [thread:$0]  (!%p3471_p9), %s291_s11, 4096, %s293_s14, [#allocation6], %s3355_s19, %s3355_s19, %s3356_s20  }
  0x19   : > { %s3358_s21 = smov 64   ;;  %s3359_s26 = smov 4  }
  0x1a   : > { %3016 = dma.hbm_to_vmem [thread:$0]  (!%p3471_p9), %s317_s27, 2048, %s319_s30, [#allocation8], %s3358_s21, %s3358_s21, %s3359_s26  }
  0x1b   : > { %s3360_s28 = smov [#allocation10]   ;;  %p2491_p10 = scmp.ge.s32.totalorder %s3351_s17, 2 }
  0x1c   : > { %s332_s18 = sshll.u32 %s3360_s28, 4  ;;  %s333_s18 = int_to_ptr.vmem [resolvable:$true] %s332_s18 }
  0x1d   : > { %3019 = dma.hbm_to_vmem [thread:$0]  (!%p3471_p9), %s331_s13, 1024, %s333_s18, [#allocation11], %s3358_s21, %s3358_s21, %s3359_s26  }
  0x1e   : > { %351 = sbr.rel (%p2491_p10) target bundleno = 47 (0x2f), region = 48 }
  0x23   : > { %362 = sbr.rel (!%p3451_p4) target bundleno = 47 (0x2f), region = 56  ;;  %s364_s3 = sand.u32 (%p3451_p4), 1, %s3347_s16  }
  0x24   : > { %s2493_s4 = sshll.u32 (%p3451_p4), %s3351_s17, 2  ;;  %s2492_s11 = sshll.u32 (%p3451_p4), %s364_s3, 5 }
  0x25   : > { %s368_s20 = scalar_lea.vmem (%p3451_p4), %s4222_s1, %s2493_s4  ;;  %s366_s24 = scalar_lea.vmem (%p3451_p4), [#allocation4], %s2492_s11 }
  0x26   : > { %v385_v1 = vld [vmem:[%s368_s20] sm:$0xf] (%p3451_p4)  ;;  %v387_v2 = vld [vmem:[%s368_s20 + $0x8] sm:$0xf] (%p3451_p4)  ;;  %v389_v3 = vld [vmem:[%s368_s20 + $0x10] sm:$0xf] (%p3451_p4) }
  0x27   : > { %386 = vst [vmem:[%s366_s24] sm:$0xf] (%p3451_p4), %v385_v1  ;;  %v391_v4 = vld [vmem:[%s368_s20 + $0x18] sm:$0xf] (%p3451_p4)  ;;  %v393_v5 = vld [vmem:[%s368_s20 + $0x20] sm:$0xf] (%p3451_p4) }
  0x28   : > { %388 = vst [vmem:[%s366_s24 + $0x4] sm:$0xf] %v387_v2  ;;  %v395_v6 = vld [vmem:[%s368_s20 + $0x28] sm:$0xf]  ;;  %v397_v7 = vld [vmem:[%s368_s20 + $0x30] sm:$0xf] }
  0x29   : > { %390 = vst [vmem:[%s366_s24 + $0x8] sm:$0xf] %v389_v3  ;;  %v399_v8 = vld [vmem:[%s368_s20 + $0x38] sm:$0xf] }
  0x2a   : > { %392 = vst [vmem:[%s366_s24 + $0xc] sm:$0xf] %v391_v4 }
  0x2b   : > { %394 = vst [vmem:[%s366_s24 + $0x10] sm:$0xf] %v393_v5 }
  0x2c   : > { %396 = vst [vmem:[%s366_s24 + $0x14] sm:$0xf] %v395_v6 }
  0x2d   : > { %398 = vst [vmem:[%s366_s24 + $0x18] sm:$0xf] %v397_v7 }
  0x2e   : > { %400 = vst [vmem:[%s366_s24 + $0x1c] sm:$0xf] %v399_v8 }
  0x2f PF: > { %443 = sbr.rel (%p3457_p7) target bundleno = 1984 (0x7c0), region = 97 }
  0x34   : > { %s446_s17 = sand.u32 1, %s3343_s15  }
  0x35   : > { %s2495_s18 = sshll.u32 %s446_s17, 5 }
  0x36   : > { %s3500_s21 = scalar_lea.vmem [#allocation4], %s2495_s18 }
  0x37   : > { %3330 = dma.done.wait (%p3020_p6), [#allocation6], 4096  }
  0x38   : > { %3332 = vsyncadd (%p3020_p6), [#allocation6], 4294963200 }
  0x39   : > { %3334 = dma.done.wait (%p3020_p6), [#allocation8], 2112  }
  0x3a   : > { %3336 = vsyncadd (%p3020_p6), [#allocation8], 4294965184 }
  0x3b   : > { %3338 = dma.done.wait (%p3020_p6), [#allocation11], 1024  }
  0x3c   : > { %3340 = vsyncadd (%p3020_p6), [#allocation11], 4294966272  ;;  %v2633_v9 = vld [vmem:[%s4223_s2 + $0xe0] sm:$0xf]  ;;  %v2933_v10 = vld [vmem:[%s4223_s2 + $0xec] sm:$0xf0] }
  0x3d   : > { %v2931_v11 = vld [vmem:[%s4223_s2 + $0xe4] sm:$0xf]  ;;  %v2634_v12 = vor.u32 %v2933_v10, %v2633_v9  ;;  %v2635_v13 = vld [vmem:[%s4223_s2 + $0xf0] sm:$0xf0]  ;;  %v2641_v14 = vld [vmem:[%s4223_s2 + $0xe8] sm:$0xf] }
  0x3e   : > { %v2934_v15 = vld [vmem:[%s4223_s2 + $0xf4] sm:$0xf0]  ;;  %v2638_v16 = vor.u32 %v2931_v11, %v2635_v13  ;;  %v2932_v18 = vld [vmem:[%s4223_s2 + $0xec] sm:$0xf]  ;;  %v2643_v19 = vld [vmem:[%s4223_s2 + $0xf8] sm:$0xf0] }
  0x3f   : > { %v2642_v17 = vor.u32 %v2934_v15, %v2641_v14  ;;  %v2617_v20 = vld [vmem:[%s4223_s2 + $0xc0] sm:$0xf]  ;;  %751 = vmatpush.bf16.msra.mxu0 %v2634_v12  ;;  %v2646_v21 = vor.u32 %v2932_v18, %v2643_v19  ;;  %v2929_v22 = vld [vmem:[%s4223_s2 + $0xcc] sm:$0xf0]  ;;  %v2927_v23 = vld [vmem:[%s4223_s2 + $0xc4] sm:$0xf] }
  0x40   : > { %v2619_v24 = vld [vmem:[%s4223_s2 + $0xd0] sm:$0xf0]  ;;  %780 = vmatpush.bf16.msra.mxu1 %v2638_v16  ;;  %v2618_v25 = vor.u32 %v2929_v22, %v2617_v20  ;;  %v2625_v27 = vld [vmem:[%s4223_s2 + $0xc8] sm:$0xf]  ;;  %v2930_v28 = vld [vmem:[%s4223_s2 + $0xd4] sm:$0xf0] }
  0x41   : > { %809 = vmatpush.bf16.msra.mxu2 %v2642_v17  ;;  %v2622_v26 = vor.u32 %v2927_v23, %v2619_v24  ;;  %v2928_v29 = vld [vmem:[%s4223_s2 + $0xcc] sm:$0xf]  ;;  %838 = vmatpush.bf16.msra.mxu3 %v2646_v21  ;;  %v2626_v30 = vor.u32 %v2930_v28, %v2625_v27  ;;  %v2627_v31 = vld [vmem:[%s4223_s2 + $0xd8] sm:$0xf0]  ;;  %v2601_v32 = vld [vmem:[%s4223_s2 + $0xa0] sm:$0xf] }
  0x42   : > { %v2925_v33 = vld [vmem:[%s4223_s2 + $0xac] sm:$0xf0]  ;;  %v2630_v34 = vor.u32 %v2928_v29, %v2627_v31  ;;  %v2923_v35 = vld [vmem:[%s4223_s2 + $0xa4] sm:$0xf]  ;;  %v2603_v36 = vld [vmem:[%s4223_s2 + $0xb0] sm:$0xf0] }
  0x43   : > { %v2609_v37 = vld [vmem:[%s4223_s2 + $0xa8] sm:$0xf]  ;;  %752 = vmatpush.bf16.msra.mxu0 %v2618_v25  ;;  %v2602_v38 = vor.u32 %v2925_v33, %v2601_v32  ;;  %v2926_v39 = vld [vmem:[%s4223_s2 + $0xb4] sm:$0xf0]  ;;  %v2924_v40 = vld [vmem:[%s4223_s2 + $0xac] sm:$0xf]  ;;  %v2606_v42 = vor.u32 %v2923_v35, %v2603_v36 }
  0x44   : > { %v2611_v41 = vld [vmem:[%s4223_s2 + $0xb8] sm:$0xf0]  ;;  %781 = vmatpush.bf16.msra.mxu1 %v2622_v26  ;;  %v2610_v43 = vor.u32 %v2926_v39, %v2609_v37  ;;  %v2585_v44 = vld [vmem:[%s4223_s2 + $0x80] sm:$0xf]  ;;  %v2921_v45 = vld [vmem:[%s4223_s2 + $0x8c] sm:$0xf0] }
  0x45   : > { %810 = vmatpush.bf16.msra.mxu2 %v2626_v30  ;;  %v2919_v46 = vld [vmem:[%s4223_s2 + $0x84] sm:$0xf]  ;;  %839 = vmatpush.bf16.msra.mxu3 %v2630_v34  ;;  %v2614_v47 = vor.u32 %v2924_v40, %v2611_v41  ;;  %v2587_v48 = vld [vmem:[%s4223_s2 + $0x90] sm:$0xf0]  ;;  %v2593_v49 = vld [vmem:[%s4223_s2 + $0x88] sm:$0xf]  ;;  %v2586_v53 = vor.u32 %v2921_v45, %v2585_v44 }
  0x46   : > { %v2922_v50 = vld [vmem:[%s4223_s2 + $0x94] sm:$0xf0]  ;;  %v2920_v51 = vld [vmem:[%s4223_s2 + $0x8c] sm:$0xf]  ;;  %v2595_v52 = vld [vmem:[%s4223_s2 + $0x98] sm:$0xf0]  ;;  %v2590_v54 = vor.u32 %v2919_v46, %v2587_v48 }
  0x47   : > { %753 = vmatpush.bf16.msra.mxu0 %v2602_v38  ;;  %v2594_v55 = vor.u32 %v2922_v50, %v2593_v49  ;;  %v2569_v56 = vld [vmem:[%s4223_s2 + $0x60] sm:$0xf]  ;;  %v2917_v57 = vld [vmem:[%s4223_s2 + $0x6c] sm:$0xf0]  ;;  %v2915_v58 = vld [vmem:[%s4223_s2 + $0x64] sm:$0xf]  ;;  %v2598_v59 = vor.u32 %v2920_v51, %v2595_v52 }
  0x48   : > { %782 = vmatpush.bf16.msra.mxu1 %v2606_v42  ;;  %v2571_v60 = vld [vmem:[%s4223_s2 + $0x70] sm:$0xf0]  ;;  %v2577_v61 = vld [vmem:[%s4223_s2 + $0x68] sm:$0xf]  ;;  %v2918_v62 = vld [vmem:[%s4223_s2 + $0x74] sm:$0xf0]  ;;  %v2570_v1 = vor.u32 %v2917_v57, %v2569_v56 }
  0x49   : > { %811 = vmatpush.bf16.msra.mxu2 %v2610_v43  ;;  %840 = vmatpush.bf16.msra.mxu3 %v2614_v47  ;;  %v2916_v63 = vld [vmem:[%s4223_s2 + $0x6c] sm:$0xf]  ;;  %v2579_v0 = vld [vmem:[%s4223_s2 + $0x78] sm:$0xf0]  ;;  %v2574_v2 = vor.u32 %v2915_v58, %v2571_v60  ;;  %v2578_v3 = vor.u32 %v2918_v62, %v2577_v61  ;;  %v2553_v4 = vld [vmem:[%s4223_s2 + $0x40] sm:$0xf] }
  0x4a   : > { %v2913_v5 = vld [vmem:[%s4223_s2 + $0x4c] sm:$0xf0]  ;;  %v2911_v6 = vld [vmem:[%s4223_s2 + $0x44] sm:$0xf]  ;;  %v2582_v7 = vor.u32 %v2916_v63, %v2579_v0  ;;  %v2555_v8 = vld [vmem:[%s4223_s2 + $0x50] sm:$0xf0] }
  0x4b   : > { %754 = vmatpush.bf16.msra.mxu0 %v2586_v53  ;;  %v2561_v9 = vld [vmem:[%s4223_s2 + $0x48] sm:$0xf]  ;;  %v2914_v10 = vld [vmem:[%s4223_s2 + $0x54] sm:$0xf0]  ;;  %v2912_v11 = vld [vmem:[%s4223_s2 + $0x4c] sm:$0xf]  ;;  %v2554_v13 = vor.u32 %v2913_v5, %v2553_v4  ;;  %v2558_v14 = vor.u32 %v2911_v6, %v2555_v8 }
  0x4c   : > { %783 = vmatpush.bf16.msra.mxu1 %v2590_v54  ;;  %v2563_v12 = vld [vmem:[%s4223_s2 + $0x58] sm:$0xf0]  ;;  %v2562_v15 = vor.u32 %v2914_v10, %v2561_v9  ;;  %v2537_v16 = vld [vmem:[%s4223_s2 + $0x20] sm:$0xf]  ;;  %v2909_v17 = vld [vmem:[%s4223_s2 + $0x2c] sm:$0xf0] }
  0x4d   : > { %812 = vmatpush.bf16.msra.mxu2 %v2594_v55  ;;  %841 = vmatpush.bf16.msra.mxu3 %v2598_v59  ;;  %v2907_v18 = vld [vmem:[%s4223_s2 + $0x24] sm:$0xf]  ;;  %v2566_v19 = vor.u32 %v2912_v11, %v2563_v12  ;;  %v2539_v20 = vld [vmem:[%s4223_s2 + $0x30] sm:$0xf0]  ;;  %v2545_v21 = vld [vmem:[%s4223_s2 + $0x28] sm:$0xf]  ;;  %v2538_v25 = vor.u32 %v2909_v17, %v2537_v16 }
  0x4e   : > { %v2910_v22 = vld [vmem:[%s4223_s2 + $0x34] sm:$0xf0]  ;;  %v2908_v23 = vld [vmem:[%s4223_s2 + $0x2c] sm:$0xf]  ;;  %v2547_v24 = vld [vmem:[%s4223_s2 + $0x38] sm:$0xf0]  ;;  %v2542_v27 = vor.u32 %v2907_v18, %v2539_v20 }
  0x4f   : > { %755 = vmatpush.bf16.msra.mxu0 %v2570_v1  ;;  %v2521_v26 = vld [vmem:[%s4223_s2] sm:$0xf]  ;;  %v2546_v28 = vor.u32 %v2910_v22, %v2545_v21  ;;  %v2905_v29 = vld [vmem:[%s4223_s2 + $0xc] sm:$0xf0]  ;;  %v2903_v30 = vld [vmem:[%s4223_s2 + $0x4] sm:$0xf]  ;;  %v2550_v32 = vor.u32 %v2908_v23, %v2547_v24 }
  0x50   : > { %784 = vmatpush.bf16.msra.mxu1 %v2574_v2  ;;  %v2523_v31 = vld [vmem:[%s4223_s2 + $0x10] sm:$0xf0]  ;;  %v2529_v33 = vld [vmem:[%s4223_s2 + $0x8] sm:$0xf]  ;;  %v2906_v34 = vld [vmem:[%s4223_s2 + $0x14] sm:$0xf0]  ;;  %v2522_v39 = vor.u32 %v2905_v29, %v2521_v26 }
  0x51   : > { %813 = vmatpush.bf16.msra.mxu2 %v2578_v3  ;;  %842 = vmatpush.bf16.msra.mxu3 %v2582_v7  ;;  %v2904_v35 = vld [vmem:[%s4223_s2 + $0xc] sm:$0xf]  ;;  %v2531_v36 = vld [vmem:[%s4223_s2 + $0x18] sm:$0xf0]  ;;  %v2825_v37 = vld [vmem:[#allocation5 + $0xe0] sm:$0xf]  ;;  %v2526_v42 = vor.u32 %v2903_v30, %v2523_v31  ;;  %v2530_v43 = vor.u32 %v2906_v34, %v2529_v33 }
  0x52   : > { %v2981_v38 = vld [vmem:[#allocation5 + $0xec] sm:$0xf0]  ;;  %v2979_v40 = vld [vmem:[#allocation5 + $0xe4] sm:$0xf]  ;;  %v2827_v41 = vld [vmem:[#allocation5 + $0xf0] sm:$0xf0]  ;;  %v2534_v44 = vor.u32 %v2904_v35, %v2531_v36 }
  0x53   : > { %756 = vmatpush.bf16.msra.mxu0 %v2554_v13  ;;  %v2899_v45 = vld [vmem:[%s3500_s21] sm:$0xff]  ;;  %v3707_v46 = vor.u32 %v2981_v38, %v2825_v37  ;;  %v2977_v48 = vld [vmem:[#allocation5 + $0xcc] sm:$0xf0]  ;;  %v3709_v49 = vor.u32 %v2979_v40, %v2827_v41  ;;  %v2811_v51 = vld [vmem:[#allocation5 + $0xd0] sm:$0xf0]  ;;  %p507_p11 = scmp.lt.s32.totalorder %s3436_s9, 1 }
  0x54   : > { %785 = vmatpush.bf16.msra.mxu1 %v2558_v14  ;;  %v2809_v47 = vld [vmem:[#allocation5 + $0xc0] sm:$0xf]  ;;  %v2975_v50 = vld [vmem:[#allocation5 + $0xc4] sm:$0xf]  ;;  %v2973_v57 = vld [vmem:[#allocation5 + $0xac] sm:$0xf0] }
  0x55   : > { %814 = vmatpush.bf16.msra.mxu2 %v2562_v15  ;;  %843 = vmatpush.bf16.msra.mxu3 %v2566_v19  ;;  %v2950_v52 = vld [vmem:[#allocation9 + $0x78] sm:$0xff]  ;;  %v3712_v53 = vor.u32 %v2977_v48, %v2809_v47  ;;  %v3715_v55 = vor.u32 %v2975_v50, %v2811_v51  ;;  %v2971_v58 = vld [vmem:[#allocation5 + $0xa4] sm:$0xf]  ;;  %v2795_v59 = vld [vmem:[#allocation5 + $0xb0] sm:$0xf0]  ;;  %s4301_s9 = smov (!%p507_p11, %s3436_s9), 1 }
  0x56   : > { %v2942_v54 = vld [vmem:[#allocation9 + $0x38] sm:$0xff]  ;;  %v2949_v60 = vld [vmem:[#allocation9 + $0x70] sm:$0xff]  ;;  %v3721_v63 = vor.u32 %v2971_v58, %v2795_v59  ;;  %v2969_v1 = vld [vmem:[#allocation5 + $0x8c] sm:$0xf0]  ;;  %s2898_s13 = sshll.u32 %s4301_s9, 3 }
  0x57   : > { %757 = vmatpush.bf16.msra.mxu0 %v2538_v25  ;;  %v2793_v56 = vld [vmem:[#allocation5 + $0xa0] sm:$0xf]  ;;  %v2941_v62 = vld [vmem:[#allocation9 + $0x30] sm:$0xff]  ;;  %v2967_v2 = vld [vmem:[#allocation5 + $0x84] sm:$0xf]  ;;  %s511_s28 = scalar_lea.vmem %s4221_s0, %s2898_s13  ;;  %s515_s24 = scalar_lea.vmem %s4231_s10, %s2898_s13 }
  0x58   : > { %786 = vmatpush.bf16.msra.mxu1 %v2542_v27  ;;  %v3718_v61 = vor.u32 %v2973_v57, %v2793_v56  ;;  %v2777_v0 = vld [vmem:[#allocation5 + $0x80] sm:$0xf]  ;;  %v2779_v3 = vld [vmem:[#allocation5 + $0x90] sm:$0xf0]  ;;  %v2948_v4 = vld [vmem:[#allocation9 + $0x68] sm:$0xff] }
  0x59   : > { %815 = vmatpush.bf16.msra.mxu2 %v2546_v28  ;;  %844 = vmatpush.bf16.msra.mxu3 %v2550_v32  ;;  %v3724_v5 = vor.u32 %v2969_v1, %v2777_v0  ;;  %v2940_v6 = vld [vmem:[#allocation9 + $0x28] sm:$0xff]  ;;  %v3727_v7 = vor.u32 %v2967_v2, %v2779_v3  ;;  %v2761_v8 = vld [vmem:[#allocation5 + $0x60] sm:$0xf]  ;;  %v2963_v10 = vld [vmem:[#allocation5 + $0x64] sm:$0xf] }
  0x5a   : > { %v2965_v9 = vld [vmem:[#allocation5 + $0x6c] sm:$0xf0]  ;;  %v2763_v11 = vld [vmem:[#allocation5 + $0x70] sm:$0xf0]  ;;  %v2947_v12 = vld [vmem:[#allocation9 + $0x60] sm:$0xff] }
  0x5b   : > { %758 = vmatpush.bf16.msra.mxu0 %v2522_v39  ;;  %v2939_v13 = vld [vmem:[#allocation9 + $0x20] sm:$0xff]  ;;  %v3730_v14 = vor.u32 %v2965_v9, %v2761_v8  ;;  %v3734_v16 = vor.u32 %v2963_v10, %v2763_v11  ;;  %v2745_v17 = vld [vmem:[#allocation5 + $0x40] sm:$0xf]  ;;  %v2961_v18 = vld [vmem:[#allocation5 + $0x4c] sm:$0xf0] }
  0x5c   : > { %787 = vmatpush.bf16.msra.mxu1 %v2526_v42  ;;  %v2900_v15 = vld [vmem:[%s3500_s21 + $0x8] sm:$0xff]  ;;  %v2959_v19 = vld [vmem:[#allocation5 + $0x44] sm:$0xf]  ;;  %v2747_v20 = vld [vmem:[#allocation5 + $0x50] sm:$0xf0]  ;;  %v3737_v23 = vor.u32 %v2961_v18, %v2745_v17 }
  0x5d   : > { %816 = vmatpush.bf16.msra.mxu2 %v2530_v43  ;;  %845 = vmatpush.bf16.msra.mxu3 %v2534_v44  ;;  %v2946_v21 = vld [vmem:[#allocation9 + $0x58] sm:$0xff]  ;;  %v3740_v24 = vor.u32 %v2959_v19, %v2747_v20  ;;  %v2945_v25 = vld [vmem:[#allocation9 + $0x50] sm:$0xff]  ;;  %v2957_v27 = vld [vmem:[#allocation5 + $0x2c] sm:$0xf0] }
  0x5e   : > { %759 = vmatmul.bf16.vlgmr.msra.gmra.mxu0 %v2899_v45  ;;  %v2938_v22 = vld [vmem:[#allocation9 + $0x18] sm:$0xff]  ;;  %v2955_v28 = vld [vmem:[#allocation5 + $0x24] sm:$0xf]  ;;  %v2937_v29 = vld [vmem:[#allocation9 + $0x10] sm:$0xff] }
  0x5f   : > { %788 = vmatmul.bf16.vlgmr.msra.gmra.mxu1 %v2899_v45  ;;  %1039 = vmatpush.bf16.msrb.mxu0 %v2942_v54  ;;  %v2729_v26 = vld [vmem:[#allocation5 + $0x20] sm:$0xf]  ;;  %v2731_v31 = vld [vmem:[#allocation5 + $0x30] sm:$0xf0]  ;;  %v2953_v34 = vld [vmem:[#allocation5 + $0xc] sm:$0xf0] }
  0x60   : > { %817 = vmatmul.bf16.vlgmr.msra.gmra.mxu2 %v2899_v45  ;;  %846 = vmatmul.bf16.vlgmr.msra.gmra.mxu3 %v2899_v45  ;;  %v3743_v30 = vor.u32 %v2957_v27, %v2729_v26  ;;  %v3746_v32 = vor.u32 %v2955_v28, %v2731_v31  ;;  %v2713_v33 = vld [vmem:[#allocation5] sm:$0xf]  ;;  %v2951_v35 = vld [vmem:[#allocation5 + $0x4] sm:$0xf]  ;;  %v2715_v36 = vld [vmem:[#allocation5 + $0x10] sm:$0xf0] }
  0x61   : > { %1262 = vmatpush.bf16.msrb.mxu2 %v3707_v46  ;;  %1275 = vmatpush.bf16.msrb.mxu3 %v3709_v49  ;;  %v2944_v37 = vld [vmem:[#allocation9 + $0x48] sm:$0xff]  ;;  %v3749_v39 = vor.u32 %v2953_v34, %v2713_v33  ;;  %v2835_v41 = vld [vmem:[#allocation5 + $0xf8] sm:$0xf0]  ;;  %v3752_v42 = vor.u32 %v2951_v35, %v2715_v36  ;;  %v2943_v43 = vld [vmem:[#allocation9 + $0x40] sm:$0xff] }
  0x62   : > { %1052 = vmatpush.bf16.msrb.mxu1 %v2950_v52  ;;  %v2936_v38 = vld [vmem:[#allocation9 + $0x8] sm:$0xff]  ;;  %v2935_v44 = vld [vmem:[#allocation9] sm:$0xff]  ;;  %v2982_v47 = vld [vmem:[#allocation5 + $0xf4] sm:$0xf0] }
  0x63   : > { %1040 = vmatpush.bf16.msrb.mxu0 %v2941_v62  ;;  %v2980_v40 = vld [vmem:[#allocation5 + $0xec] sm:$0xf]  ;;  %v2833_v45 = vld [vmem:[#allocation5 + $0xe8] sm:$0xf]  ;;  %v2901_v50 = vld [vmem:[%s3500_s21 + $0x10] sm:$0xff] }
  0x64   : > { %v3754_v48 = vor.u32 %v2980_v40, %v2835_v41  ;;  %v2976_v51 = vld [vmem:[#allocation5 + $0xcc] sm:$0xf]  ;;  %v2819_v52 = vld [vmem:[#allocation5 + $0xd8] sm:$0xf0]  ;;  %v3761_v54 = vor.u32 %v2982_v47, %v2833_v45  ;;  %v2817_v56 = vld [vmem:[#allocation5 + $0xc8] sm:$0xf] }
  0x65   : > { %1263 = vmatpush.bf16.msrb.mxu2 %v3712_v53  ;;  %1276 = vmatpush.bf16.msrb.mxu3 %v3715_v55  ;;  %v2978_v57 = vld [vmem:[#allocation5 + $0xd4] sm:$0xf0]  ;;  %v3764_v58 = vor.u32 %v2976_v51, %v2819_v52  ;;  %v2972_v59 = vld [vmem:[#allocation5 + $0xac] sm:$0xf]  ;;  %v2801_v0 = vld [vmem:[#allocation5 + $0xa8] sm:$0xf] }
  0x66   : > { %1053 = vmatpush.bf16.msrb.mxu1 %v2949_v60  ;;  %v2803_v60 = vld [vmem:[#allocation5 + $0xb8] sm:$0xf0]  ;;  %v3768_v62 = vor.u32 %v2978_v57, %v2817_v56  ;;  %v2974_v1 = vld [vmem:[#allocation5 + $0xb4] sm:$0xf0]  ;;  %v2968_v3 = vld [vmem:[#allocation5 + $0x8c] sm:$0xf] }
  0x67   : > { %1041 = vmatpush.bf16.msrb.mxu0 %v2940_v6  ;;  %v3771_v2 = vor.u32 %v2972_v59, %v2803_v60  ;;  %v3361_v6 = vmov 0   ;;  %v3777_v8 = vor.u32 %v2974_v1, %v2801_v0  ;;  %v2785_v9 = vld [vmem:[#allocation5 + $0x88] sm:$0xf]  ;;  %v2970_v10 = vld [vmem:[#allocation5 + $0x94] sm:$0xf0]  ;;  %v899_v40 = vld [vmem:[%s511_s28] sm:$0xff] }
  0x68   : > { %3061 = vset.pattern.permute.xlu0 %v3361_v6  ;;  %v2769_v17 = vld [vmem:[#allocation5 + $0x68] sm:$0xf]  ;;  %v2966_v18 = vld [vmem:[#allocation5 + $0x74] sm:$0xf0]  ;;  %v2739_v31 = vld [vmem:[#allocation5 + $0x38] sm:$0xf0]  ;;  %v937_v47 = vunpack.c.l.b16 %v899_v40 }
  0x69   : > { %1264 = vmatpush.bf16.msrb.mxu2 %v3718_v61  ;;  %1277 = vmatpush.bf16.msrb.mxu3 %v3721_v63  ;;  %v2902_v20 = vld [vmem:[%s3500_s21 + $0x18] sm:$0xff]  ;;  %v2753_v26 = vld [vmem:[#allocation5 + $0x48] sm:$0xf]  ;;  %v557_v57 = vld [vmem:[#allocation7] sm:$0xf] }
  0x6a   : > { %1054 = vmatpush.bf16.msrb.mxu1 %v2948_v4  ;;  %v2787_v4 = vld [vmem:[#allocation5 + $0x98] sm:$0xf0]  ;;  %v2962_v27 = vld [vmem:[#allocation5 + $0x54] sm:$0xf0]  ;;  %v2737_v34 = vld [vmem:[#allocation5 + $0x28] sm:$0xf]  ;;  %v939_v52 = vpack.c.b16 %v937_v47, %v937_v47 }
  0x6b   : > { %1042 = vmatpush.bf16.msrb.mxu0 %v2939_v13  ;;  %v3780_v11 = vor.u32 %v2968_v3, %v2787_v4  ;;  %v2771_v13 = vld [vmem:[#allocation5 + $0x78] sm:$0xf0]  ;;  %v3812_v33 = vor.u32 %v2962_v27, %v2753_v26  ;;  %v2958_v35 = vld [vmem:[#allocation5 + $0x34] sm:$0xf0]  ;;  %v3883_v59 = vperm.slane %v557_v57, 0  ;;  %v3885_v60 = vperm.slane %v557_v57, 1 }
  0x6c   : > { %v3820_v41 = vor.u32 %v2958_v35, %v2737_v34 }
  0x6d   : > { %1265 = vmatpush.bf16.msrb.mxu2 %v3724_v5  ;;  %1278 = vmatpush.bf16.msrb.mxu3 %v3727_v7  ;;  %4246 = vst [vmem:[#allocation17_spill] sm:$0xff] %v3883_v59 }
  0x6e   : > { %1055 = vmatpush.bf16.msrb.mxu1 %v2947_v12  ;;  %764 = vmatmul.bf16.gmra.mxu0 %v2900_v15  ;;  %v2964_v12 = vld [vmem:[#allocation5 + $0x6c] sm:$0xf]  ;;  %4247 = vst [vmem:[#allocation18_spill] sm:$0xff] %v3885_v60 }
  0x6f   : > { %793 = vmatmul.bf16.gmra.mxu1 %v2900_v15  ;;  %1043 = vmatpush.bf16.msrb.mxu0 %v2938_v22  ;;  %v3792_v19 = vor.u32 %v2964_v12, %v2771_v13  ;;  %v2755_v22 = vld [vmem:[#allocation5 + $0x58] sm:$0xf0] }
  0x70   : > { %822 = vmatmul.bf16.gmra.mxu2 %v2900_v15  ;;  %851 = vmatmul.bf16.gmra.mxu3 %v2900_v15  ;;  %v3786_v15 = vor.u32 %v2970_v10, %v2785_v9  ;;  %v3897_v9 = vperm.slane %v557_v57, 3 }
  0x71   : > { %1266 = vmatpush.bf16.msrb.mxu2 %v3730_v14  ;;  %1279 = vmatpush.bf16.msrb.mxu3 %v3734_v16 }
  0x72   : > { %1056 = vmatpush.bf16.msrb.mxu1 %v2946_v21  ;;  %v2960_v21 = vld [vmem:[#allocation5 + $0x4c] sm:$0xf] }
  0x73   : > { %1044 = vmatpush.bf16.msrb.mxu0 %v2937_v29  ;;  %v3802_v28 = vor.u32 %v2960_v21, %v2755_v22  ;;  %v2956_v29 = vld [vmem:[#allocation5 + $0x2c] sm:$0xf] }
  0x74   : > { %v3815_v36 = vor.u32 %v2956_v29, %v2739_v31 }
  0x75   : > { %1267 = vmatpush.bf16.msrb.mxu2 %v3737_v23  ;;  %1280 = vmatpush.bf16.msrb.mxu3 %v3740_v24 }
  0x76   : > { %1057 = vmatpush.bf16.msrb.mxu1 %v2945_v25  ;;  %v3798_v25 = vor.u32 %v2966_v18, %v2769_v17 }
  0x77   : > { %1045 = vmatpush.bf16.msrb.mxu0 %v2936_v38  ;;  %v2723_v38 = vld [vmem:[#allocation5 + $0x18] sm:$0xf0] }
  0x79   : > { %1268 = vmatpush.bf16.msrb.mxu2 %v3743_v30  ;;  %1281 = vmatpush.bf16.msrb.mxu3 %v3746_v32 }
  0x7a   : > { %1058 = vmatpush.bf16.msrb.mxu1 %v2944_v37  ;;  %v2952_v37 = vld [vmem:[#allocation5 + $0xc] sm:$0xf] }
  0x7b   : > { %1046 = vmatpush.bf16.msrb.mxu0 %v2935_v44  ;;  %v2954_v44 = vld [vmem:[#allocation5 + $0x14] sm:$0xf0]  ;;  %v3823_v45 = vor.u32 %v2952_v37, %v2723_v38 }
  0x7d   : > { %1269 = vmatpush.bf16.msrb.mxu2 %v3749_v39  ;;  %1282 = vmatpush.bf16.msrb.mxu3 %v3752_v42 }
  0x7e   : > { %1059 = vmatpush.bf16.msrb.mxu1 %v2943_v43  ;;  %769 = vmatmul.bf16.gmra.mxu0 %v2901_v50  ;;  %v2721_v43 = vld [vmem:[#allocation5 + $0x8] sm:$0xf] }
  0x7f   : > { %798 = vmatmul.bf16.gmra.mxu1 %v2901_v50  ;;  %1288 = vmatpush.bf16.msra.mxu0 %v3761_v54  ;;  %v3828_v51 = vor.u32 %v2954_v44, %v2721_v43 }
  0x80   : > { %827 = vmatmul.bf16.gmra.mxu2 %v2901_v50  ;;  %856 = vmatmul.bf16.gmra.mxu3 %v2901_v50  ;;  %v938_v50 = vunpack.c.h.b16 %v899_v40 }
  0x81   : > { %1387 = vmatpush.bf16.msra.mxu2 %v3707_v46  ;;  %1400 = vmatpush.bf16.msra.mxu3 %v3709_v49 }
  0x82   : > { %1301 = vmatpush.bf16.msra.mxu1 %v3754_v48  ;;  %v940_v56 = vpack.c.b16 %v938_v50, %v938_v50 }
  0x83   : > { %1289 = vmatpush.bf16.msra.mxu0 %v3768_v62 }
  0x85   : > { %1388 = vmatpush.bf16.msra.mxu2 %v3712_v53  ;;  %1401 = vmatpush.bf16.msra.mxu3 %v3715_v55 }
  0x86   : > { %1302 = vmatpush.bf16.msra.mxu1 %v3764_v58 }
  0x87   : > { %1290 = vmatpush.bf16.msra.mxu0 %v3777_v8 }
  0x89   : > { %1389 = vmatpush.bf16.msra.mxu2 %v3718_v61  ;;  %1402 = vmatpush.bf16.msra.mxu3 %v3721_v63 }
  0x8a   : > { %1303 = vmatpush.bf16.msra.mxu1 %v3771_v2 }
  0x8b   : > { %1291 = vmatpush.bf16.msra.mxu0 %v3786_v15 }
  0x8d   : > { %1390 = vmatpush.bf16.msra.mxu2 %v3724_v5  ;;  %1403 = vmatpush.bf16.msra.mxu3 %v3727_v7 }
  0x8e   : > { %1304 = vmatpush.bf16.msra.mxu1 %v3780_v11  ;;  %774 = vmatmul.bf16.gmra.mxu0 %v2902_v20 }
  0x8f   : > { %803 = vmatmul.bf16.gmra.mxu1 %v2902_v20  ;;  %1292 = vmatpush.bf16.msra.mxu0 %v3798_v25 }
  0x90   : > { %832 = vmatmul.bf16.gmra.mxu2 %v2902_v20  ;;  %861 = vmatmul.bf16.gmra.mxu3 %v2902_v20 }
  0x91   : > { %1391 = vmatpush.bf16.msra.mxu2 %v3730_v14  ;;  %1404 = vmatpush.bf16.msra.mxu3 %v3734_v16 }
  0x92   : > { %1305 = vmatpush.bf16.msra.mxu1 %v3792_v19 }
  0x93   : > { %1293 = vmatpush.bf16.msra.mxu0 %v3812_v33 }
  0x95   : > { %1392 = vmatpush.bf16.msra.mxu2 %v3737_v23  ;;  %1405 = vmatpush.bf16.msra.mxu3 %v3740_v24 }
  0x96   : > { %1306 = vmatpush.bf16.msra.mxu1 %v3802_v28 }
  0x97   : > { %1294 = vmatpush.bf16.msra.mxu0 %v3820_v41 }
  0x99   : > { %1393 = vmatpush.bf16.msra.mxu2 %v3743_v30  ;;  %1406 = vmatpush.bf16.msra.mxu3 %v3746_v32 }
  0x9a   : > { %1307 = vmatpush.bf16.msra.mxu1 %v3815_v36 }
  0x9b   : > { %1295 = vmatpush.bf16.msra.mxu0 %v3828_v51 }
  0x9d   : > { %1394 = vmatpush.bf16.msra.mxu2 %v3749_v39  ;;  %1407 = vmatpush.bf16.msra.mxu3 %v3752_v42 }
  0x9e   : > { %1308 = vmatpush.bf16.msra.mxu1 %v3823_v45  ;;  %1047 = vmatmul.bf16.vlgmr.msrb.gmra.mxu0 %v939_v52 }
  0x9f   : > { %1060 = vmatmul.bf16.vlgmr.msrb.gmra.mxu1 %v940_v56  ;;  %1413 = vmatpush.bf16.msrb.mxu0 %v3761_v54 }
  0xa0   : > { %1270 = vmatmul.bf16.vlgmr.msrb.gmra.mxu2 %v3361_v6  ;;  %1283 = vmatmul.bf16.vlgmr.msrb.gmra.mxu3 %v3361_v6 }
  0xa1   : > { %1512 = vmatpush.bf16.msrb.mxu2 %v3707_v46  ;;  %1525 = vmatpush.bf16.msrb.mxu3 %v3709_v49 }
  0xa2   : > { %1426 = vmatpush.bf16.msrb.mxu1 %v3754_v48 }
  0xa3   : > { %1414 = vmatpush.bf16.msrb.mxu0 %v3768_v62 }
  0xa5   : > { %1513 = vmatpush.bf16.msrb.mxu2 %v3712_v53  ;;  %1526 = vmatpush.bf16.msrb.mxu3 %v3715_v55 }
  0xa6   : > { %1427 = vmatpush.bf16.msrb.mxu1 %v3764_v58 }
  0xa7   : > { %1415 = vmatpush.bf16.msrb.mxu0 %v3777_v8 }
  0xa9   : > { %1514 = vmatpush.bf16.msrb.mxu2 %v3718_v61  ;;  %1527 = vmatpush.bf16.msrb.mxu3 %v3721_v63 }
  0xaa   : > { %1428 = vmatpush.bf16.msrb.mxu1 %v3771_v2 }
  0xab   : > { %1416 = vmatpush.bf16.msrb.mxu0 %v3786_v15 }
  0xad   : > { %1515 = vmatpush.bf16.msrb.mxu2 %v3724_v5  ;;  %1528 = vmatpush.bf16.msrb.mxu3 %v3727_v7 }
  0xae   : > { %1429 = vmatpush.bf16.msrb.mxu1 %v3780_v11  ;;  %1296 = vmatmul.bf16.vlgmr.msra.gmra.mxu0 %v3361_v6 }
  0xaf   : > { %1309 = vmatmul.bf16.vlgmr.msra.gmra.mxu1 %v3361_v6  ;;  %1417 = vmatpush.bf16.msrb.mxu0 %v3798_v25  ;;  %v3895_v6 = vperm.slane %v557_v57, 2 }
  0xb1   : > { %1516 = vmatpush.bf16.msrb.mxu2 %v3730_v14  ;;  %1529 = vmatpush.bf16.msrb.mxu3 %v3734_v16  ;;  %4250 = vst [vmem:[#allocation21_spill] sm:$0xff] %v3895_v6 }
  0xb2   : > { %1430 = vmatpush.bf16.msrb.mxu1 %v3792_v19 }
  0xb3   : > { %1418 = vmatpush.bf16.msrb.mxu0 %v3812_v33 }
  0xb5   : > { %1517 = vmatpush.bf16.msrb.mxu2 %v3737_v23  ;;  %1530 = vmatpush.bf16.msrb.mxu3 %v3740_v24 }
  0xb6   : > { %1431 = vmatpush.bf16.msrb.mxu1 %v3802_v28 }
  0xb7   : > { %1419 = vmatpush.bf16.msrb.mxu0 %v3820_v41 }
  0xb9   : > { %1518 = vmatpush.bf16.msrb.mxu2 %v3743_v30  ;;  %1531 = vmatpush.bf16.msrb.mxu3 %v3746_v32 }
  0xba   : > { %1432 = vmatpush.bf16.msrb.mxu1 %v3815_v36 }
  0xbb   : > { %1420 = vmatpush.bf16.msrb.mxu0 %v3828_v51 }
  0xbd   : > { %1519 = vmatpush.bf16.msrb.mxu2 %v3749_v39  ;;  %1532 = vmatpush.bf16.msrb.mxu3 %v3752_v42 }
  0xbe   : > { %1433 = vmatpush.bf16.msrb.mxu1 %v3823_v45 }
  0xbf   : > { %1538 = vmatpush.bf16.msra.mxu0 %v3761_v54 }
  0xc2   : > { %1551 = vmatpush.bf16.msra.mxu1 %v3754_v48 }
  0xc3   : > { %1539 = vmatpush.bf16.msra.mxu0 %v3768_v62 }
  0xc6   : > { %1552 = vmatpush.bf16.msra.mxu1 %v3764_v58 }
  0xc7   : > { %1540 = vmatpush.bf16.msra.mxu0 %v3777_v8 }
  0xca   : > { %1553 = vmatpush.bf16.msra.mxu1 %v3771_v2 }
  0xcb   : > { %1541 = vmatpush.bf16.msra.mxu0 %v3786_v15 }
  0xce   : > { %1554 = vmatpush.bf16.msra.mxu1 %v3780_v11 }
  0xcf   : > { %1542 = vmatpush.bf16.msra.mxu0 %v3798_v25 }
  0xd2   : > { %1555 = vmatpush.bf16.msra.mxu1 %v3792_v19 }
  0xd3   : > { %1543 = vmatpush.bf16.msra.mxu0 %v3812_v33 }
  0xd6   : > { %1556 = vmatpush.bf16.msra.mxu1 %v3802_v28 }
  0xd7   : > { %1544 = vmatpush.bf16.msra.mxu0 %v3820_v41 }
  0xda   : > { %1557 = vmatpush.bf16.msra.mxu1 %v3815_v36 }
  0xdb   : > { %1545 = vmatpush.bf16.msra.mxu0 %v3828_v51  ;;  %v760_v0 = vpop.f32.mrf.mxu0 }
  0xdc   : > { %v3890_v1 = vadd.f32 %v760_v0, %v3883_v59  ;;  %v789_v3 = vpop.f32.mrf.mxu1 }
  0xdd   : > { %v3893_v4 = vadd.f32 %v789_v3, %v3885_v60 }
  0xde   : > { %1558 = vmatpush.bf16.msra.mxu1 %v3823_v45  ;;  %4248 = vst [vmem:[#allocation19_spill] sm:$0xff] %v3890_v1 }
  0xdf   : > { %4249 = vst [vmem:[#allocation20_spill] sm:$0xff] %v3893_v4 }
  0xe3   : > { %v818_v10 = vpop.f32.mrf.mxu2  ;;  %v847_v13 = vpop.f32.mrf.mxu3 }
  0xe4   : > { %v3900_v12 = vadd.f32 %v818_v10, %v3895_v6  ;;  %v3902_v17 = vpop.f32.mrf.mxu0  ;;  %v3905_v18 = vadd.f32 %v847_v13, %v3897_v9  ;;  %v3907_v20 = vpop.f32.mrf.mxu1 }
  0xe5   : > { %4252 = vst [vmem:[#allocation23_spill] sm:$0xff] %v3902_v17 }
  0xe6   : > { %4251 = vst [vmem:[#allocation22_spill] sm:$0xff] %v3900_v12 }
  0xe7   : > { %4253 = vst [vmem:[#allocation24_spill] sm:$0xff] %v3905_v18 }
  0xe8   : > { %4254 = vst [vmem:[#allocation25_spill] sm:$0xff] %v3907_v20 }
  0xeb   : > { %v3909_v21 = vpop.f32.mrf.mxu2  ;;  %v849_v22 = vpop.f32.mrf.mxu3 }
  0xec   : > { %4255 = vst [vmem:[#allocation26_spill] sm:$0xff] %v3909_v21  ;;  %v765_v26 = vpop.f32.mrf.mxu0  ;;  %v3912_v27 = vadd.f32 %v849_v22, %v3897_v9  ;;  %v794_v31 = vpop.f32.mrf.mxu1 }
  0xed   : > { %v3915_v29 = vadd.f32 %v765_v26, %v3883_v59  ;;  %v3918_v34 = vadd.f32 %v794_v31, %v3885_v60 }
  0xee   : > { %4256 = vst [vmem:[#allocation27_spill] sm:$0xff] %v3912_v27 }
  0xef   : > { %4257 = vst [vmem:[#allocation28_spill] sm:$0xff] %v3915_v29 }
  0xf0   : > { %4258 = vst [vmem:[#allocation29_spill] sm:$0xff] %v3918_v34 }
  0xf3   : > { %v823_v35 = vpop.f32.mrf.mxu2  ;;  %v852_v38 = vpop.f32.mrf.mxu3 }
  0xf4   : > { %v3921_v37 = vadd.f32 %v823_v35, %v3895_v6  ;;  %v767_v40 = vpop.f32.mrf.mxu0  ;;  %v3924_v43 = vadd.f32 %v852_v38, %v3897_v9  ;;  %v796_v47 = vpop.f32.mrf.mxu1 }
  0xf5   : > { %v3927_v44 = vadd.f32 %v767_v40, %v3883_v59  ;;  %v3930_v50 = vadd.f32 %v796_v47, %v3885_v60 }
  0xf6   : > { %4259 = vst [vmem:[#allocation30_spill] sm:$0xff] %v3921_v37 }
  0xf7   : > { %4260 = vst [vmem:[#allocation31_spill] sm:$0xff] %v3924_v43 }
  0xf8   : > { %4261 = vst [vmem:[#allocation32_spill] sm:$0xff] %v3927_v44 }
  0xf9   : > { %4262 = vst [vmem:[#allocation33_spill] sm:$0xff] %v3930_v50 }
  0xfb   : > { %v825_v52 = vpop.f32.mrf.mxu2  ;;  %v854_v57 = vpop.f32.mrf.mxu3 }
  0xfc   : > { %v3933_v56 = vadd.f32 %v825_v52, %v3895_v6  ;;  %v770_v0 = vpop.f32.mrf.mxu0  ;;  %v3936_v3 = vadd.f32 %v854_v57, %v3897_v9  ;;  %v799_v13 = vpop.f32.mrf.mxu1 }
  0xfd   : > { %v3939_v10 = vadd.f32 %v770_v0, %v3883_v59  ;;  %v3942_v22 = vadd.f32 %v799_v13, %v3885_v60 }
  0xfe   : > { %4263 = vst [vmem:[#allocation34_spill] sm:$0xff] %v3933_v56 }
  0xff   : > { %4264 = vst [vmem:[#allocation35_spill] sm:$0xff] %v3936_v3 }
 0x100   : > { %4265 = vst [vmem:[#allocation36_spill] sm:$0xff] %v3939_v10 }
 0x101   : > { %4266 = vst [vmem:[#allocation37_spill] sm:$0xff] %v3942_v22 }
 0x103   : > { %v828_v26 = vpop.f32.mrf.mxu2  ;;  %v857_v35 = vpop.f32.mrf.mxu3 }
 0x104   : > { %v3945_v31 = vadd.f32 %v828_v26, %v3895_v6  ;;  %v772_v38 = vpop.f32.mrf.mxu0  ;;  %v3948_v40 = vadd.f32 %v857_v35, %v3897_v9  ;;  %v801_v52 = vpop.f32.mrf.mxu1 }
 0x105   : > { %v3951_v47 = vadd.f32 %v772_v38, %v3883_v59  ;;  %v3954_v57 = vadd.f32 %v801_v52, %v3885_v60 }
 0x106   : > { %4267 = vst [vmem:[#allocation38_spill] sm:$0xff] %v3945_v31 }
 0x107   : > { %4268 = vst [vmem:[#allocation39_spill] sm:$0xff] %v3948_v40 }
 0x10b   : > { %v830_v0 = vpop.f32.mrf.mxu2  ;;  %v859_v12 = vpop.f32.mrf.mxu3 }
 0x10c   : > { %v3957_v13 = vadd.f32 %v830_v0, %v3895_v6  ;;  %v775_v4 = vpop.f32.mrf.mxu0  ;;  %v3960_v26 = vadd.f32 %v859_v12, %v3897_v9  ;;  %v804_v35 = vpop.f32.mrf.mxu1  ;;  %v3062_v12 = vld [vmem:[%s4228_s7] ss:$0 sm:$0xff] }
 0x10d   : > { %v3963_v1 = vadd.f32 %v775_v4, %v3883_v59  ;;  %v3966_v38 = vadd.f32 %v804_v35, %v3885_v60 }
 0x10e   : > { %4269 = vst [vmem:[#allocation40_spill] sm:$0xff] %v3957_v13 }
 0x113   : > { %v833_v18 = vpop.f32.mrf.mxu2  ;;  %v862_v21 = vpop.f32.mrf.mxu3 }
 0x114   : > { %v3969_v52 = vadd.f32 %v833_v18, %v3895_v6  ;;  %v777_v20 = vpop.f32.mrf.mxu0  ;;  %v3972_v0 = vadd.f32 %v862_v21, %v3897_v9  ;;  %v806_v17 = vpop.f32.mrf.mxu1 }
 0x115   : > { %v778_v18 = vadd.f32 %v777_v20, %v3883_v59  ;;  %v807_v43 = vadd.f32 %v806_v17, %v3885_v60 }
 0x11b   : > { %v835_v4 = vpop.f32.mrf.mxu2  ;;  %v864_v27 = vpop.f32.mrf.mxu3 }
 0x11c   : > { %v1048_v37 = vpop.f32.mrf.mxu0  ;;  %v1061_v35 = vpop.f32.mrf.mxu1 }
 0x11d   : > { %v1049_v34 = vadd.f32 %v3062_v12, %v1048_v37  ;;  %v865_v37 = vadd.f32 %v864_v27, %v3897_v9 }
 0x11f   : > { %v3977_v29 = vadd.f32 %v1061_v35, %v1049_v34 }
 0x121   : > { %4270 = vst [vmem:[#allocation41_spill] sm:$0xff] %v3977_v29 }
 0x123   : > { %v1271_v56 = vpop.f32.mrf.mxu2  ;;  %v1284_v21 = vpop.f32.mrf.mxu3 }
 0x124   : > { %v1314_v50 = vadd.f32 %v1271_v56, %v778_v18  ;;  %v1050_v44 = vpop.f32.mrf.mxu0  ;;  %v1315_v3 = vadd.f32 %v1284_v21, %v807_v43  ;;  %v1063_v31 = vpop.f32.mrf.mxu1 }
 0x125   : > { %v836_v44 = vadd.f32 %v835_v4, %v3895_v6 }
 0x126   : > { %v2839_v22 = vmul.f32 -1.442695, %v1314_v50  ;;  %v2840_v10 = vmul.f32 -1.442695, %v1315_v3 }
 0x128   : > { %3065 = vpow2.f32 %v2839_v22 }
 0x129   : > { %3067 = vpow2.f32 %v2840_v10 }
 0x12b   : > { %v1273_v40 = vpop.f32.mrf.mxu2  ;;  %v1286_v12 = vpop.f32.mrf.mxu3 }
 0x12c   : > { %v1297_v34 = vpop.f32.mrf.mxu0  ;;  %v1310_v35 = vpop.f32.mrf.mxu1 }
 0x12d   : > { %v1317_v20 = vadd.f32 %v1310_v35, %v865_v37  ;;  %v1316_v10 = vadd.f32 %v1297_v34, %v836_v44 }
 0x12e   : > { %v3066_v29 = vpop.eup %3065 }
 0x12f   : > { %v3068_v59 = vpop.eup %3067  ;;  %v1321_v17 = vadd.f32 1.0, %v3066_v29  ;;  %v2841_v56 = vmul.f32 -1.442695, %v1317_v20 }
 0x130   : > { %v1340_v60 = vadd.f32 1.0, %v3068_v59 }
 0x131   : > { %3069 = vrcp.f32 %v1321_v17  ;;  %v1331_v37 = vand.u32 2147483647, %v1321_v17  ;;  %v1333_v29 = vand.u32 2147483648, %v1321_v17  ;;  %vm1327_vm2 = vweird.f32 %v1321_v17 }
 0x132   : > { %3071 = vrcp.f32 %v1340_v60  ;;  %v1352_v59 = vand.u32 2147483648, %v1340_v60  ;;  %v1350_v4 = vand.u32 2147483647, %v1340_v60  ;;  %vm1346_vm3 = vweird.f32 %v1340_v60 }
 0x133   : > { %3073 = vpow2.f32 %v2841_v56  ;;  %v1334_v34 = vor.u32 1.1754944e-38, %v1333_v29  ;;  %vm1332_vm5 = vcmp.eq.f32.partialorder %v1331_v37, 8.507059e+37 }
 0x134   : > { %v1299_v43 = vpop.f32.mrf.mxu0  ;;  %v1312_v50 = vpop.f32.mrf.mxu1  ;;  %3075 = vtanh.f32 %v1316_v10  ;;  %vm1351_vm7 = vcmp.eq.f32.partialorder %v1350_v4, 8.507059e+37 }
 0x135   : > { %v1353_v43 = vor.u32 1.1754944e-38, %v1352_v59 }
 0x137   : > { %v3070_v3 = vpop.eup %3069 }
 0x138   : > { %v3072_v22 = vpop.eup %3071  ;;  %v1323_v9 = vmul.f32 %v3070_v3, %v1321_v17  ;;  %vm1328_vm0 = vweird.f32 %v3070_v3 }
 0x139   : > { %v3074_v27 = vpop.eup %3073  ;;  %v1342_v31 = vmul.f32 %v3072_v22, %v1340_v60  ;;  %vm1347_vm1 = vweird.f32 %v3072_v22  ;;  %vm1329_vm4 = vmor %vm1327_vm2, %vm1328_vm0 }
 0x13a   : > { %v1324_v40 = vsub.f32 1.0, %v1323_v9  ;;  %v1360_v18 = vadd.f32 1.0, %v3074_v27  ;;  %vm1348_vm6 = vmor %vm1346_vm3, %vm1347_vm1  ;;  %v3076_v50 = vpop.eup %3075 }
 0x13b   : > { %v1343_v21 = vsub.f32 1.0, %v1342_v31 }
 0x13c   : > { %v1325_v12 = vmul.f32 %v3070_v3, %v1324_v40  ;;  %3077 = vrcp.f32 %v1360_v18  ;;  %v1372_v60 = vand.u32 2147483648, %v1360_v18  ;;  %vm1366_vm9 = vweird.f32 %v1360_v18 }
 0x13d   : > { %v1344_v35 = vmul.f32 %v3072_v22, %v1343_v21 }
 0x13e   : > { %v1326_v20 = vadd.f32 %v3070_v3, %v1325_v12  ;;  %v1373_v59 = vor.u32 1.1754944e-38, %v1372_v60 }
 0x13f   : > { %v1345_v56 = vadd.f32 %v3072_v22, %v1344_v35 }
 0x140   : > { %v1330_v44 = vsel %vm1329_vm4, %v3070_v3, %v1326_v20  ;;  %v1370_v3 = vand.u32 2147483647, %v1360_v18 }
 0x141   : > { %v1335_v9 = vsel %vm1332_vm5, %v1334_v34, %v1330_v44  ;;  %v1349_v10 = vsel %vm1348_vm6, %v3072_v22, %v1345_v56 }
 0x142   : > { %v3078_v27 = vpop.eup %3077  ;;  %v1354_v31 = vsel %vm1351_vm7, %v1353_v43, %v1349_v10  ;;  %v1377_v40 = vmul.f32 %v3076_v50, %v1335_v9  ;;  %vm1371_vm11 = vcmp.eq.f32.partialorder %v1370_v3, 8.507059e+37 }
 0x143   : > { %v1376_v21 = vmul.f32 0.0, %v1354_v31  ;;  %v1362_v6 = vmul.f32 %v3078_v27, %v1360_v18  ;;  %vm1367_vm8 = vweird.f32 %v3078_v27 }
 0x144   : > { %vm1368_vm10 = vmor %vm1366_vm9, %vm1367_vm8 }
 0x145   : > { %v3983_v13 = vadd.f32 %v1377_v40, %v1376_v21  ;;  %v1363_v17 = vsub.f32 1.0, %v1362_v6 }
 0x147   : > { %3079 = vtanh.f32 %v3983_v13  ;;  %v1364_v29 = vmul.f32 %v3078_v27, %v1363_v17 }
 0x149   : > { %v1365_v37 = vadd.f32 %v3078_v27, %v1364_v29 }
 0x14b   : > { %v1369_v22 = vsel %vm1368_vm10, %v3078_v27, %v1365_v37 }
 0x14c   : > { %v1374_v12 = vsel %vm1371_vm11, %v1373_v59, %v1369_v22 }
 0x14d   : > { %v3080_v35 = vpop.eup %3079 }
 0x14e   : > { %v1380_v4 = vmul.f32 %v3080_v35, %v1374_v12 }
 0x150   : > { %v1381_v20 = vpack.c.bf16 %v1380_v4, %v1380_v4 }
 0x152   : > { %1395 = vmatmul.bf16.vlgmr.msra.gmra.mxu2 %v1381_v20  ;;  %1408 = vmatmul.bf16.vlgmr.msra.gmra.mxu3 %v1381_v20 }
 0x153   : > { %1421 = vmatmul.bf16.vlgmr.msrb.gmra.mxu0 %v1381_v20  ;;  %1434 = vmatmul.bf16.vlgmr.msrb.gmra.mxu1 %v1381_v20 }
 0x154   : > { %1637 = vmatpush.bf16.msra.mxu2 %v3707_v46  ;;  %1650 = vmatpush.bf16.msra.mxu3 %v3709_v49 }
 0x155   : > { %1663 = vmatpush.bf16.msrb.mxu0 %v3761_v54  ;;  %1676 = vmatpush.bf16.msrb.mxu1 %v3754_v48 }
 0x158   : > { %1638 = vmatpush.bf16.msra.mxu2 %v3712_v53  ;;  %1651 = vmatpush.bf16.msra.mxu3 %v3715_v55 }
 0x159   : > { %1664 = vmatpush.bf16.msrb.mxu0 %v3768_v62  ;;  %1677 = vmatpush.bf16.msrb.mxu1 %v3764_v58 }
 0x15c   : > { %1639 = vmatpush.bf16.msra.mxu2 %v3718_v61  ;;  %1652 = vmatpush.bf16.msra.mxu3 %v3721_v63 }
 0x15d   : > { %1665 = vmatpush.bf16.msrb.mxu0 %v3777_v8  ;;  %1678 = vmatpush.bf16.msrb.mxu1 %v3771_v2 }
 0x160   : > { %1640 = vmatpush.bf16.msra.mxu2 %v3724_v5  ;;  %1653 = vmatpush.bf16.msra.mxu3 %v3727_v7 }
 0x161   : > { %1666 = vmatpush.bf16.msrb.mxu0 %v3786_v15  ;;  %1679 = vmatpush.bf16.msrb.mxu1 %v3780_v11 }
 0x164   : > { %1641 = vmatpush.bf16.msra.mxu2 %v3730_v14  ;;  %1654 = vmatpush.bf16.msra.mxu3 %v3734_v16 }
 0x165   : > { %1667 = vmatpush.bf16.msrb.mxu0 %v3798_v25  ;;  %1680 = vmatpush.bf16.msrb.mxu1 %v3792_v19 }
 0x168   : > { %1642 = vmatpush.bf16.msra.mxu2 %v3737_v23  ;;  %1655 = vmatpush.bf16.msra.mxu3 %v3740_v24 }
 0x169   : > { %1668 = vmatpush.bf16.msrb.mxu0 %v3812_v33  ;;  %1681 = vmatpush.bf16.msrb.mxu1 %v3802_v28 }
 0x16c   : > { %1643 = vmatpush.bf16.msra.mxu2 %v3743_v30  ;;  %1656 = vmatpush.bf16.msra.mxu3 %v3746_v32 }
 0x16d   : > { %1669 = vmatpush.bf16.msrb.mxu0 %v3820_v41  ;;  %1682 = vmatpush.bf16.msrb.mxu1 %v3815_v36 }
 0x170   : > { %1644 = vmatpush.bf16.msra.mxu2 %v3749_v39  ;;  %1657 = vmatpush.bf16.msra.mxu3 %v3752_v42 }
 0x171   : > { %1670 = vmatpush.bf16.msrb.mxu0 %v3828_v51  ;;  %1683 = vmatpush.bf16.msrb.mxu1 %v3823_v45 }
 0x1d0   : > { %v1422_v6 = vpop.f32.mrf.mxu0  ;;  %v1435_v18 = vpop.f32.mrf.mxu1 }
 0x1d1   : > { %v1442_v34 = vadd.f32 %v1435_v18, %v3972_v0 }
 0x1d3   : > { %v2844_v56 = vmul.f32 -1.442695, %v1442_v34 }
 0x1d5   : > { %3081 = vpow2.f32 %v2844_v56  ;;  %v1396_v43 = vpop.f32.mrf.mxu2  ;;  %v1409_v44 = vpop.f32.mrf.mxu3 }
 0x1d6   : > { %v1439_v50 = vadd.f32 %v1396_v43, %v3963_v1  ;;  %v1440_v9 = vadd.f32 %v1409_v44, %v3966_v38  ;;  %v1441_v38 = vadd.f32 %v1422_v6, %v3969_v52 }
 0x1d8   : > { %v2842_v10 = vmul.f32 -1.442695, %v1439_v50  ;;  %v2843_v27 = vmul.f32 -1.442695, %v1440_v9  ;;  %v1424_v31 = vpop.f32.mrf.mxu0  ;;  %v1437_v40 = vpop.f32.mrf.mxu1 }
 0x1da   : > { %3083 = vpow2.f32 %v2842_v10 }
 0x1db   : > { %v3082_v21 = vpop.eup %3081  ;;  %3085 = vpow2.f32 %v2843_v27 }
 0x1dc   : > { %v1485_v29 = vadd.f32 1.0, %v3082_v21 }
 0x1dd   : > { %v1398_v17 = vpop.f32.mrf.mxu2  ;;  %v1411_v60 = vpop.f32.mrf.mxu3 }
 0x1de   : > { %3087 = vrcp.f32 %v1485_v29  ;;  %vm1491_vm5 = vweird.f32 %v1485_v29 }
 0x1e0   : > { %v3084_v3 = vpop.eup %3083 }
 0x1e1   : > { %v3086_v0 = vpop.eup %3085  ;;  %v1446_v37 = vadd.f32 1.0, %v3084_v3 }
 0x1e2   : > { %v1465_v59 = vadd.f32 1.0, %v3086_v0 }
 0x1e3   : > { %3089 = vrcp.f32 %v1446_v37  ;;  %v1458_v34 = vand.u32 2147483648, %v1446_v37  ;;  %v1456_v44 = vand.u32 2147483647, %v1446_v37  ;;  %vm1452_vm14 = vweird.f32 %v1446_v37 }
 0x1e4   : > { %3091 = vrcp.f32 %v1465_v59  ;;  %v3088_v1 = vpop.eup %3087  ;;  %v1477_v50 = vand.u32 2147483648, %v1465_v59  ;;  %v1475_v10 = vand.u32 2147483647, %v1465_v59  ;;  %vm1471_vm0 = vweird.f32 %v1465_v59 }
 0x1e5   : > { %v1487_v20 = vmul.f32 %v3088_v1, %v1485_v29  ;;  %3093 = vtanh.f32 %v1441_v38  ;;  %v1459_v52 = vor.u32 1.1754944e-38, %v1458_v34  ;;  %vm1457_vm1 = vcmp.eq.f32.partialorder %v1456_v44, 8.507059e+37 }
 0x1e6   : > { %v1478_v21 = vor.u32 1.1754944e-38, %v1477_v50  ;;  %vm1476_vm3 = vcmp.eq.f32.partialorder %v1475_v10, 8.507059e+37  ;;  %vm1492_vm4 = vweird.f32 %v3088_v1 }
 0x1e7   : > { %v1488_v27 = vsub.f32 1.0, %v1487_v20  ;;  %vm1493_vm6 = vmor %vm1491_vm5, %vm1492_vm4 }
 0x1e9   : > { %v3090_v22 = vpop.eup %3089  ;;  %v1489_v38 = vmul.f32 %v3088_v1, %v1488_v27 }
 0x1ea   : > { %v3092_v12 = vpop.eup %3091  ;;  %v1448_v35 = vmul.f32 %v3090_v22, %v1446_v37  ;;  %vm1453_vm12 = vweird.f32 %v3090_v22 }
 0x1eb   : > { %v1467_v4 = vmul.f32 %v3092_v12, %v1465_v59  ;;  %vm1472_vm13 = vweird.f32 %v3092_v12  ;;  %vm1454_vm15 = vmor %vm1452_vm14, %vm1453_vm12  ;;  %v3094_v17 = vpop.eup %3093  ;;  %v1490_v37 = vadd.f32 %v3088_v1, %v1489_v38  ;;  %v1495_v59 = vand.u32 2147483647, %v1485_v29 }
 0x1ec   : > { %v1449_v18 = vsub.f32 1.0, %v1448_v35  ;;  %vm1473_vm2 = vmor %vm1471_vm0, %vm1472_vm13 }
 0x1ed   : > { %v1468_v56 = vsub.f32 1.0, %v1467_v4  ;;  %vm1496_vm7 = vcmp.eq.f32.partialorder %v1495_v59, 8.507059e+37 }
 0x1ee   : > { %v1450_v43 = vmul.f32 %v3090_v22, %v1449_v18  ;;  %v1497_v18 = vand.u32 2147483648, %v1485_v29 }
 0x1ef   : > { %v1469_v9 = vmul.f32 %v3092_v12, %v1468_v56 }
 0x1f0   : > { %v1451_v31 = vadd.f32 %v3090_v22, %v1450_v43  ;;  %v1498_v34 = vor.u32 1.1754944e-38, %v1497_v18 }
 0x1f1   : > { %v1470_v6 = vadd.f32 %v3092_v12, %v1469_v9 }
 0x1f2   : > { %v1455_v40 = vsel %vm1454_vm15, %v3090_v22, %v1451_v31  ;;  %v1494_v22 = vsel %vm1493_vm6, %v3088_v1, %v1490_v37 }
 0x1f3   : > { %v1460_v60 = vsel %vm1457_vm1, %v1459_v52, %v1455_v40  ;;  %v1474_v3 = vsel %vm1473_vm2, %v3092_v12, %v1470_v6  ;;  %v1499_v56 = vsel %vm1496_vm7, %v1498_v34, %v1494_v22 }
 0x1f4   : > { %v1479_v0 = vsel %vm1476_vm3, %v1478_v21, %v1474_v3  ;;  %v1502_v35 = vmul.f32 %v3094_v17, %v1460_v60 }
 0x1f5   : > { %v1501_v4 = vmul.f32 %v1479_v0, %v3983_v13 }
 0x1f7   : > { %v4023_v20 = vadd.f32 %v1502_v35, %v1501_v4 }
 0x1f9   : > { %3095 = vtanh.f32 %v4023_v20 }
 0x1ff   : > { %v3096_v12 = vpop.eup %3095 }
 0x200   : > { %v1505_v43 = vmul.f32 %v3096_v12, %v1499_v56 }
 0x202   : > { %v1506_v44 = vpack.c.bf16 %v1505_v43, %v1505_v43 }
 0x204   : > { %1520 = vmatmul.bf16.vlgmr.msrb.gmra.mxu2 %v1506_v44  ;;  %1533 = vmatmul.bf16.vlgmr.msrb.gmra.mxu3 %v1506_v44 }
 0x205   : > { %1546 = vmatmul.bf16.vlgmr.msra.gmra.mxu0 %v1506_v44  ;;  %1559 = vmatmul.bf16.vlgmr.msra.gmra.mxu1 %v1506_v44 }
 0x206   : > { %1762 = vmatpush.bf16.msrb.mxu2 %v3707_v46  ;;  %1775 = vmatpush.bf16.msrb.mxu3 %v3709_v49 }
 0x207   : > { %1788 = vmatpush.bf16.msra.mxu0 %v3761_v54  ;;  %1801 = vmatpush.bf16.msra.mxu1 %v3754_v48 }
 0x20a   : > { %1763 = vmatpush.bf16.msrb.mxu2 %v3712_v53  ;;  %1776 = vmatpush.bf16.msrb.mxu3 %v3715_v55 }
 0x20b   : > { %1789 = vmatpush.bf16.msra.mxu0 %v3768_v62  ;;  %1802 = vmatpush.bf16.msra.mxu1 %v3764_v58 }
 0x20e   : > { %1764 = vmatpush.bf16.msrb.mxu2 %v3718_v61  ;;  %1777 = vmatpush.bf16.msrb.mxu3 %v3721_v63 }
 0x20f   : > { %1790 = vmatpush.bf16.msra.mxu0 %v3777_v8  ;;  %1803 = vmatpush.bf16.msra.mxu1 %v3771_v2 }
 0x212   : > { %1765 = vmatpush.bf16.msrb.mxu2 %v3724_v5  ;;  %1778 = vmatpush.bf16.msrb.mxu3 %v3727_v7 }
 0x213   : > { %1791 = vmatpush.bf16.msra.mxu0 %v3786_v15  ;;  %1804 = vmatpush.bf16.msra.mxu1 %v3780_v11 }
 0x216   : > { %1766 = vmatpush.bf16.msrb.mxu2 %v3730_v14  ;;  %1779 = vmatpush.bf16.msrb.mxu3 %v3734_v16 }
 0x217   : > { %1792 = vmatpush.bf16.msra.mxu0 %v3798_v25  ;;  %1805 = vmatpush.bf16.msra.mxu1 %v3792_v19 }
 0x21a   : > { %1767 = vmatpush.bf16.msrb.mxu2 %v3737_v23  ;;  %1780 = vmatpush.bf16.msrb.mxu3 %v3740_v24 }
 0x21b   : > { %1793 = vmatpush.bf16.msra.mxu0 %v3812_v33  ;;  %1806 = vmatpush.bf16.msra.mxu1 %v3802_v28 }
 0x21e   : > { %1768 = vmatpush.bf16.msrb.mxu2 %v3743_v30  ;;  %1781 = vmatpush.bf16.msrb.mxu3 %v3746_v32 }
 0x21f   : > { %1794 = vmatpush.bf16.msra.mxu0 %v3820_v41  ;;  %1807 = vmatpush.bf16.msra.mxu1 %v3815_v36 }
 0x222   : > { %1769 = vmatpush.bf16.msrb.mxu2 %v3749_v39  ;;  %1782 = vmatpush.bf16.msrb.mxu3 %v3752_v42 }
 0x223   : > { %1795 = vmatpush.bf16.msra.mxu0 %v3828_v51  ;;  %1808 = vmatpush.bf16.msra.mxu1 %v3823_v45 }
 0x282   : > { %v1547_v13 = vpop.f32.mrf.mxu0  ;;  %v1560_v29 = vpop.f32.mrf.mxu1 }
 0x283   : > { %v1567_v1 = vadd.f32 %v1560_v29, %v3960_v26 }
 0x285   : > { %v2847_v50 = vmul.f32 -1.442695, %v1567_v1 }
 0x287   : > { %3097 = vpow2.f32 %v2847_v50  ;;  %v1521_v9 = vpop.f32.mrf.mxu2  ;;  %v1534_v10 = vpop.f32.mrf.mxu3 }
 0x288   : > { %v1564_v27 = vadd.f32 %v1521_v9, %v3951_v47  ;;  %v1565_v31 = vadd.f32 %v1534_v10, %v3954_v57  ;;  %v4271_v57 = vld [vmem:[#allocation40_spill] sm:$0xff] }
 0x289   : > { %v1566_v18 = vadd.f32 %v1547_v13, %v4271_v57 }
 0x28a   : > { %v2845_v52 = vmul.f32 -1.442695, %v1564_v27  ;;  %v2846_v6 = vmul.f32 -1.442695, %v1565_v31  ;;  %v1549_v40 = vpop.f32.mrf.mxu0  ;;  %v1562_v21 = vpop.f32.mrf.mxu1 }
 0x28c   : > { %3099 = vpow2.f32 %v2845_v52 }
 0x28d   : > { %v3098_v17 = vpop.eup %3097  ;;  %3101 = vpow2.f32 %v2846_v6 }
 0x28e   : > { %v1610_v0 = vadd.f32 1.0, %v3098_v17 }
 0x28f   : > { %v1523_v60 = vpop.f32.mrf.mxu2  ;;  %v1536_v3 = vpop.f32.mrf.mxu3 }
 0x290   : > { %3103 = vrcp.f32 %v1610_v0  ;;  %vm1616_vm1 = vweird.f32 %v1610_v0 }
 0x292   : > { %v3100_v38 = vpop.eup %3099 }
 0x293   : > { %v3102_v26 = vpop.eup %3101  ;;  %v1571_v35 = vadd.f32 1.0, %v3100_v38 }
 0x294   : > { %v1590_v4 = vadd.f32 1.0, %v3102_v26 }
 0x295   : > { %3105 = vrcp.f32 %v1571_v35  ;;  %v1583_v43 = vand.u32 2147483648, %v1571_v35  ;;  %v1581_v1 = vand.u32 2147483647, %v1571_v35  ;;  %vm1577_vm10 = vweird.f32 %v1571_v35 }
 0x296   : > { %3107 = vrcp.f32 %v1590_v4  ;;  %v3104_v47 = vpop.eup %3103  ;;  %v1602_v50 = vand.u32 2147483648, %v1590_v4  ;;  %v1600_v10 = vand.u32 2147483647, %v1590_v4  ;;  %vm1596_vm12 = vweird.f32 %v1590_v4 }
 0x297   : > { %v1612_v12 = vmul.f32 %v3104_v47, %v1610_v0  ;;  %3109 = vtanh.f32 %v1566_v18  ;;  %v1584_v13 = vor.u32 1.1754944e-38, %v1583_v43  ;;  %vm1582_vm13 = vcmp.eq.f32.partialorder %v1581_v1, 8.507059e+37 }
 0x298   : > { %v1603_v40 = vor.u32 1.1754944e-38, %v1602_v50  ;;  %vm1601_vm15 = vcmp.eq.f32.partialorder %v1600_v10, 8.507059e+37  ;;  %vm1617_vm0 = vweird.f32 %v3104_v47 }
 0x299   : > { %v1613_v27 = vsub.f32 1.0, %v1612_v12  ;;  %vm1618_vm2 = vmor %vm1616_vm1, %vm1617_vm0 }
 0x29b   : > { %v3106_v37 = vpop.eup %3105  ;;  %v1614_v38 = vmul.f32 %v3104_v47, %v1613_v27  ;;  %v4274_v27 = vld [vmem:[#allocation37_spill] sm:$0xff] }
 0x29c   : > { %v3108_v59 = vpop.eup %3107  ;;  %v1573_v22 = vmul.f32 %v3106_v37, %v1571_v35  ;;  %vm1578_vm8 = vweird.f32 %v3106_v37 }
 0x29d   : > { %v1592_v34 = vmul.f32 %v3108_v59, %v1590_v4  ;;  %vm1597_vm9 = vweird.f32 %v3108_v59  ;;  %vm1579_vm11 = vmor %vm1577_vm10, %vm1578_vm8  ;;  %v3110_v21 = vpop.eup %3109  ;;  %v1615_v35 = vadd.f32 %v3104_v47, %v1614_v38  ;;  %v1620_v4 = vand.u32 2147483647, %v1610_v0 }
 0x29e   : > { %v1574_v56 = vsub.f32 1.0, %v1573_v22  ;;  %vm1598_vm14 = vmor %vm1596_vm12, %vm1597_vm9  ;;  %v1622_v22 = vand.u32 2147483648, %v1610_v0 }
 0x29f   : > { %v1593_v44 = vsub.f32 1.0, %v1592_v34  ;;  %vm1621_vm3 = vcmp.eq.f32.partialorder %v1620_v4, 8.507059e+37 }
 0x2a0   : > { %v1575_v29 = vmul.f32 %v3106_v37, %v1574_v56  ;;  %v1623_v34 = vor.u32 1.1754944e-38, %v1622_v22 }
 0x2a1   : > { %v1594_v9 = vmul.f32 %v3108_v59, %v1593_v44 }
 0x2a2   : > { %v1576_v31 = vadd.f32 %v3106_v37, %v1575_v29 }
 0x2a3   : > { %v1595_v52 = vadd.f32 %v3108_v59, %v1594_v9  ;;  %v4273_v9 = vld [vmem:[#allocation36_spill] sm:$0xff] }
 0x2a4   : > { %v1580_v6 = vsel %vm1579_vm11, %v3106_v37, %v1576_v31  ;;  %v1619_v37 = vsel %vm1618_vm2, %v3104_v47, %v1615_v35  ;;  %v4272_v47 = vld [vmem:[#allocation39_spill] sm:$0xff] }
 0x2a5   : > { %v1585_v17 = vsel %vm1582_vm13, %v1584_v13, %v1580_v6  ;;  %v1599_v60 = vsel %vm1598_vm14, %v3108_v59, %v1595_v52  ;;  %v1624_v12 = vsel %vm1621_vm3, %v1623_v34, %v1619_v37  ;;  %v4275_v37 = vld [vmem:[#allocation38_spill] sm:$0xff] }
 0x2a6   : > { %v1604_v3 = vsel %vm1601_vm15, %v1603_v40, %v1599_v60  ;;  %v1627_v26 = vmul.f32 %v3110_v21, %v1585_v17 }
 0x2a7   : > { %v1626_v57 = vmul.f32 %v1604_v3, %v4023_v20 }
 0x2a9   : > { %v4063_v18 = vadd.f32 %v1627_v26, %v1626_v57 }
 0x2ab   : > { %3111 = vtanh.f32 %v4063_v18 }
 0x2b1   : > { %v3112_v59 = vpop.eup %3111 }
 0x2b2   : > { %v1630_v56 = vmul.f32 %v3112_v59, %v1624_v12 }
 0x2b4   : > { %v1631_v43 = vpack.c.bf16 %v1630_v56, %v1630_v56 }
 0x2b6   : > { %1645 = vmatmul.bf16.vlgmr.msra.gmra.mxu2 %v1631_v43  ;;  %1658 = vmatmul.bf16.vlgmr.msra.gmra.mxu3 %v1631_v43 }
 0x2b7   : > { %1671 = vmatmul.bf16.vlgmr.msrb.gmra.mxu0 %v1631_v43  ;;  %1684 = vmatmul.bf16.vlgmr.msrb.gmra.mxu1 %v1631_v43 }
 0x2b8   : > { %1887 = vmatpush.bf16.msra.mxu2 %v3707_v46  ;;  %1900 = vmatpush.bf16.msra.mxu3 %v3709_v49 }
 0x2b9   : > { %1913 = vmatpush.bf16.msrb.mxu0 %v3761_v54  ;;  %1926 = vmatpush.bf16.msrb.mxu1 %v3754_v48 }
 0x2bc   : > { %1888 = vmatpush.bf16.msra.mxu2 %v3712_v53  ;;  %1901 = vmatpush.bf16.msra.mxu3 %v3715_v55 }
 0x2bd   : > { %1914 = vmatpush.bf16.msrb.mxu0 %v3768_v62  ;;  %1927 = vmatpush.bf16.msrb.mxu1 %v3764_v58 }
 0x2c0   : > { %1889 = vmatpush.bf16.msra.mxu2 %v3718_v61  ;;  %1902 = vmatpush.bf16.msra.mxu3 %v3721_v63 }
 0x2c1   : > { %1915 = vmatpush.bf16.msrb.mxu0 %v3777_v8  ;;  %1928 = vmatpush.bf16.msrb.mxu1 %v3771_v2 }
 0x2c4   : > { %1890 = vmatpush.bf16.msra.mxu2 %v3724_v5  ;;  %1903 = vmatpush.bf16.msra.mxu3 %v3727_v7 }
 0x2c5   : > { %1916 = vmatpush.bf16.msrb.mxu0 %v3786_v15  ;;  %1929 = vmatpush.bf16.msrb.mxu1 %v3780_v11 }
 0x2c8   : > { %1891 = vmatpush.bf16.msra.mxu2 %v3730_v14  ;;  %1904 = vmatpush.bf16.msra.mxu3 %v3734_v16 }
 0x2c9   : > { %1917 = vmatpush.bf16.msrb.mxu0 %v3798_v25  ;;  %1930 = vmatpush.bf16.msrb.mxu1 %v3792_v19 }
 0x2cc   : > { %1892 = vmatpush.bf16.msra.mxu2 %v3737_v23  ;;  %1905 = vmatpush.bf16.msra.mxu3 %v3740_v24 }
 0x2cd   : > { %1918 = vmatpush.bf16.msrb.mxu0 %v3812_v33  ;;  %1931 = vmatpush.bf16.msrb.mxu1 %v3802_v28 }
 0x2d0   : > { %1893 = vmatpush.bf16.msra.mxu2 %v3743_v30  ;;  %1906 = vmatpush.bf16.msra.mxu3 %v3746_v32 }
 0x2d1   : > { %1919 = vmatpush.bf16.msrb.mxu0 %v3820_v41  ;;  %1932 = vmatpush.bf16.msrb.mxu1 %v3815_v36 }
 0x2d4   : > { %1894 = vmatpush.bf16.msra.mxu2 %v3749_v39  ;;  %1907 = vmatpush.bf16.msra.mxu3 %v3752_v42 }
 0x2d5   : > { %1920 = vmatpush.bf16.msrb.mxu0 %v3828_v51  ;;  %1933 = vmatpush.bf16.msrb.mxu1 %v3823_v45 }
 0x334   : > { %v1672_v20 = vpop.f32.mrf.mxu0  ;;  %v1685_v0 = vpop.f32.mrf.mxu1 }
 0x335   : > { %v1692_v44 = vadd.f32 %v1685_v0, %v4272_v47  ;;  %v1691_v34 = vadd.f32 %v1672_v20, %v4275_v37 }
 0x337   : > { %v2850_v29 = vmul.f32 -1.442695, %v1692_v44 }
 0x339   : > { %3113 = vpow2.f32 %v2850_v29  ;;  %v1646_v1 = vpop.f32.mrf.mxu2  ;;  %v1659_v50 = vpop.f32.mrf.mxu3 }
 0x33a   : > { %v1689_v10 = vadd.f32 %v1646_v1, %v4273_v9  ;;  %v1690_v31 = vadd.f32 %v1659_v50, %v4274_v27 }
 0x33c   : > { %v2848_v13 = vmul.f32 -1.442695, %v1689_v10  ;;  %v2849_v52 = vmul.f32 -1.442695, %v1690_v31  ;;  %v1674_v6 = vpop.f32.mrf.mxu0  ;;  %v1687_v40 = vpop.f32.mrf.mxu1 }
 0x33e   : > { %3115 = vpow2.f32 %v2848_v13 }
 0x33f   : > { %v3114_v21 = vpop.eup %3113  ;;  %3117 = vpow2.f32 %v2849_v52 }
 0x340   : > { %v1735_v3 = vadd.f32 1.0, %v3114_v21 }
 0x341   : > { %v1648_v17 = vpop.f32.mrf.mxu2  ;;  %v1661_v60 = vpop.f32.mrf.mxu3 }
 0x342   : > { %3119 = vrcp.f32 %v1735_v3  ;;  %vm1741_vm13 = vweird.f32 %v1735_v3 }
 0x344   : > { %v3116_v38 = vpop.eup %3115 }
 0x345   : > { %v3118_v26 = vpop.eup %3117  ;;  %v1696_v57 = vadd.f32 1.0, %v3116_v38 }
 0x346   : > { %v1715_v35 = vadd.f32 1.0, %v3118_v26 }
 0x347   : > { %3121 = vrcp.f32 %v1696_v57  ;;  %v1708_v47 = vand.u32 2147483648, %v1696_v57  ;;  %v1706_v1 = vand.u32 2147483647, %v1696_v57  ;;  %vm1702_vm6 = vweird.f32 %v1696_v57 }
 0x348   : > { %3123 = vrcp.f32 %v1715_v35  ;;  %v3120_v22 = vpop.eup %3119  ;;  %v1727_v50 = vand.u32 2147483648, %v1715_v35  ;;  %v1725_v10 = vand.u32 2147483647, %v1715_v35  ;;  %vm1721_vm8 = vweird.f32 %v1715_v35 }
 0x349   : > { %v1737_v43 = vmul.f32 %v3120_v22, %v1735_v3  ;;  %3125 = vtanh.f32 %v1691_v34  ;;  %v1709_v20 = vor.u32 1.1754944e-38, %v1708_v47  ;;  %vm1707_vm9 = vcmp.eq.f32.partialorder %v1706_v1, 8.507059e+37 }
 0x34a   : > { %v1728_v6 = vor.u32 1.1754944e-38, %v1727_v50  ;;  %vm1726_vm11 = vcmp.eq.f32.partialorder %v1725_v10, 8.507059e+37  ;;  %vm1742_vm12 = vweird.f32 %v3120_v22 }
 0x34b   : > { %v1738_v27 = vsub.f32 1.0, %v1737_v43  ;;  %vm1743_vm14 = vmor %vm1741_vm13, %vm1742_vm12 }
 0x34d   : > { %v3122_v4 = vpop.eup %3121  ;;  %v1739_v38 = vmul.f32 %v3120_v22, %v1738_v27  ;;  %v4278_v27 = vld [vmem:[#allocation33_spill] sm:$0xff] }
 0x34e   : > { %v3124_v59 = vpop.eup %3123  ;;  %v1698_v12 = vmul.f32 %v3122_v4, %v1696_v57  ;;  %vm1703_vm4 = vweird.f32 %v3122_v4 }
 0x34f   : > { %v1717_v56 = vmul.f32 %v3124_v59, %v1715_v35  ;;  %vm1722_vm5 = vweird.f32 %v3124_v59  ;;  %vm1704_vm7 = vmor %vm1702_vm6, %vm1703_vm4  ;;  %v3126_v40 = vpop.eup %3125  ;;  %v1740_v57 = vadd.f32 %v3120_v22, %v1739_v38  ;;  %v1745_v35 = vand.u32 2147483647, %v1735_v3 }
 0x350   : > { %v1699_v0 = vsub.f32 1.0, %v1698_v12  ;;  %vm1723_vm10 = vmor %vm1721_vm8, %vm1722_vm5  ;;  %v1747_v12 = vand.u32 2147483648, %v1735_v3 }
 0x351   : > { %v1718_v44 = vsub.f32 1.0, %v1717_v56  ;;  %vm1746_vm15 = vcmp.eq.f32.partialorder %v1745_v35, 8.507059e+37 }
 0x352   : > { %v1700_v29 = vmul.f32 %v3122_v4, %v1699_v0  ;;  %v1748_v56 = vor.u32 1.1754944e-38, %v1747_v12 }
 0x353   : > { %v1719_v9 = vmul.f32 %v3124_v59, %v1718_v44 }
 0x354   : > { %v1701_v31 = vadd.f32 %v3122_v4, %v1700_v29 }
 0x355   : > { %v1720_v13 = vadd.f32 %v3124_v59, %v1719_v9  ;;  %v4277_v9 = vld [vmem:[#allocation32_spill] sm:$0xff] }
 0x356   : > { %v1705_v52 = vsel %vm1704_vm7, %v3122_v4, %v1701_v31  ;;  %v1744_v4 = vsel %vm1743_vm14, %v3120_v22, %v1740_v57  ;;  %v4276_v22 = vld [vmem:[#allocation35_spill] sm:$0xff] }
 0x357   : > { %v1710_v21 = vsel %vm1707_vm9, %v1709_v20, %v1705_v52  ;;  %v1724_v17 = vsel %vm1723_vm10, %v3124_v59, %v1720_v13  ;;  %v1749_v43 = vsel %vm1746_vm15, %v1748_v56, %v1744_v4  ;;  %v4279_v4 = vld [vmem:[#allocation34_spill] sm:$0xff] }
 0x358   : > { %v1729_v60 = vsel %vm1726_vm11, %v1728_v6, %v1724_v17  ;;  %v1752_v26 = vmul.f32 %v3126_v40, %v1710_v21 }
 0x359   : > { %v1751_v37 = vmul.f32 %v1729_v60, %v4063_v18 }
 0x35b   : > { %v4103_v34 = vadd.f32 %v1752_v26, %v1751_v37 }
 0x35d   : > { %3127 = vtanh.f32 %v4103_v34 }
 0x363   : > { %v3128_v59 = vpop.eup %3127 }
 0x364   : > { %v1755_v0 = vmul.f32 %v3128_v59, %v1749_v43 }
 0x366   : > { %v1756_v47 = vpack.c.bf16 %v1755_v0, %v1755_v0 }
 0x368   : > { %1770 = vmatmul.bf16.vlgmr.msrb.gmra.mxu2 %v1756_v47  ;;  %1783 = vmatmul.bf16.vlgmr.msrb.gmra.mxu3 %v1756_v47 }
 0x369   : > { %1796 = vmatmul.bf16.vlgmr.msra.gmra.mxu0 %v1756_v47  ;;  %1809 = vmatmul.bf16.vlgmr.msra.gmra.mxu1 %v1756_v47 }
 0x36a   : > { %2012 = vmatpush.bf16.msrb.mxu2 %v3707_v46  ;;  %2025 = vmatpush.bf16.msrb.mxu3 %v3709_v49 }
 0x36b   : > { %2038 = vmatpush.bf16.msra.mxu0 %v3761_v54  ;;  %2051 = vmatpush.bf16.msra.mxu1 %v3754_v48 }
 0x36e   : > { %2013 = vmatpush.bf16.msrb.mxu2 %v3712_v53  ;;  %2026 = vmatpush.bf16.msrb.mxu3 %v3715_v55 }
 0x36f   : > { %2039 = vmatpush.bf16.msra.mxu0 %v3768_v62  ;;  %2052 = vmatpush.bf16.msra.mxu1 %v3764_v58 }
 0x372   : > { %2014 = vmatpush.bf16.msrb.mxu2 %v3718_v61  ;;  %2027 = vmatpush.bf16.msrb.mxu3 %v3721_v63 }
 0x373   : > { %2040 = vmatpush.bf16.msra.mxu0 %v3777_v8  ;;  %2053 = vmatpush.bf16.msra.mxu1 %v3771_v2 }
 0x376   : > { %2015 = vmatpush.bf16.msrb.mxu2 %v3724_v5  ;;  %2028 = vmatpush.bf16.msrb.mxu3 %v3727_v7 }
 0x377   : > { %2041 = vmatpush.bf16.msra.mxu0 %v3786_v15  ;;  %2054 = vmatpush.bf16.msra.mxu1 %v3780_v11 }
 0x37a   : > { %2016 = vmatpush.bf16.msrb.mxu2 %v3730_v14  ;;  %2029 = vmatpush.bf16.msrb.mxu3 %v3734_v16 }
 0x37b   : > { %2042 = vmatpush.bf16.msra.mxu0 %v3798_v25  ;;  %2055 = vmatpush.bf16.msra.mxu1 %v3792_v19 }
 0x37e   : > { %2017 = vmatpush.bf16.msrb.mxu2 %v3737_v23  ;;  %2030 = vmatpush.bf16.msrb.mxu3 %v3740_v24 }
 0x37f   : > { %2043 = vmatpush.bf16.msra.mxu0 %v3812_v33  ;;  %2056 = vmatpush.bf16.msra.mxu1 %v3802_v28 }
 0x382   : > { %2018 = vmatpush.bf16.msrb.mxu2 %v3743_v30  ;;  %2031 = vmatpush.bf16.msrb.mxu3 %v3746_v32 }
 0x383   : > { %2044 = vmatpush.bf16.msra.mxu0 %v3820_v41  ;;  %2057 = vmatpush.bf16.msra.mxu1 %v3815_v36 }
 0x386   : > { %2019 = vmatpush.bf16.msrb.mxu2 %v3749_v39  ;;  %2032 = vmatpush.bf16.msrb.mxu3 %v3752_v42 }
 0x387   : > { %2045 = vmatpush.bf16.msra.mxu0 %v3828_v51  ;;  %2058 = vmatpush.bf16.msra.mxu1 %v3823_v45 }
 0x3e6   : > { %v1797_v18 = vpop.f32.mrf.mxu0  ;;  %v1810_v3 = vpop.f32.mrf.mxu1 }
 0x3e7   : > { %v1817_v44 = vadd.f32 %v1810_v3, %v4276_v22  ;;  %v1816_v56 = vadd.f32 %v1797_v18, %v4279_v4 }
 0x3e9   : > { %v2853_v29 = vmul.f32 -1.442695, %v1817_v44 }
 0x3eb   : > { %3129 = vpow2.f32 %v2853_v29  ;;  %v1771_v1 = vpop.f32.mrf.mxu2  ;;  %v1784_v50 = vpop.f32.mrf.mxu3 }
 0x3ec   : > { %v1814_v10 = vadd.f32 %v1771_v1, %v4277_v9  ;;  %v1815_v31 = vadd.f32 %v1784_v50, %v4278_v27 }
 0x3ee   : > { %v2851_v20 = vmul.f32 -1.442695, %v1814_v10  ;;  %v2852_v13 = vmul.f32 -1.442695, %v1815_v31  ;;  %v1799_v52 = vpop.f32.mrf.mxu0  ;;  %v1812_v6 = vpop.f32.mrf.mxu1 }
 0x3f0   : > { %3131 = vpow2.f32 %v2851_v20 }
 0x3f1   : > { %v3130_v40 = vpop.eup %3129  ;;  %3133 = vpow2.f32 %v2852_v13 }
 0x3f2   : > { %v1860_v60 = vadd.f32 1.0, %v3130_v40 }
 0x3f3   : > { %v1773_v21 = vpop.f32.mrf.mxu2  ;;  %v1786_v17 = vpop.f32.mrf.mxu3 }
 0x3f4   : > { %3135 = vrcp.f32 %v1860_v60  ;;  %vm1866_vm9 = vweird.f32 %v1860_v60 }
 0x3f6   : > { %v3132_v38 = vpop.eup %3131 }
 0x3f7   : > { %v3134_v26 = vpop.eup %3133  ;;  %v1821_v37 = vadd.f32 1.0, %v3132_v38 }
 0x3f8   : > { %v1840_v57 = vadd.f32 1.0, %v3134_v26 }
 0x3f9   : > { %3137 = vrcp.f32 %v1821_v37  ;;  %v1833_v22 = vand.u32 2147483648, %v1821_v37  ;;  %v1831_v1 = vand.u32 2147483647, %v1821_v37  ;;  %vm1827_vm2 = vweird.f32 %v1821_v37 }
 0x3fa   : > { %3139 = vrcp.f32 %v1840_v57  ;;  %v3136_v12 = vpop.eup %3135  ;;  %v1852_v50 = vand.u32 2147483648, %v1840_v57  ;;  %v1850_v10 = vand.u32 2147483647, %v1840_v57  ;;  %vm1846_vm4 = vweird.f32 %v1840_v57 }
 0x3fb   : > { %v1862_v47 = vmul.f32 %v3136_v12, %v1860_v60  ;;  %3141 = vtanh.f32 %v1816_v56  ;;  %v1834_v18 = vor.u32 1.1754944e-38, %v1833_v22  ;;  %vm1832_vm5 = vcmp.eq.f32.partialorder %v1831_v1, 8.507059e+37 }
 0x3fc   : > { %v1853_v52 = vor.u32 1.1754944e-38, %v1852_v50  ;;  %vm1851_vm7 = vcmp.eq.f32.partialorder %v1850_v10, 8.507059e+37  ;;  %vm1867_vm8 = vweird.f32 %v3136_v12 }
 0x3fd   : > { %v1863_v27 = vsub.f32 1.0, %v1862_v47  ;;  %vm1868_vm10 = vmor %vm1866_vm9, %vm1867_vm8 }
 0x3ff   : > { %v3138_v35 = vpop.eup %3137  ;;  %v1864_v38 = vmul.f32 %v3136_v12, %v1863_v27 }
 0x400   : > { %v3140_v59 = vpop.eup %3139  ;;  %v1823_v43 = vmul.f32 %v3138_v35, %v1821_v37  ;;  %vm1828_vm0 = vweird.f32 %v3138_v35 }
 0x401   : > { %v1842_v0 = vmul.f32 %v3140_v59, %v1840_v57  ;;  %vm1847_vm1 = vweird.f32 %v3140_v59  ;;  %vm1829_vm3 = vmor %vm1827_vm2, %vm1828_vm0  ;;  %v3142_v6 = vpop.eup %3141  ;;  %v1865_v37 = vadd.f32 %v3136_v12, %v1864_v38  ;;  %v1870_v57 = vand.u32 2147483647, %v1860_v60 }
 0x402   : > { %v1824_v3 = vsub.f32 1.0, %v1823_v43  ;;  %vm1848_vm6 = vmor %vm1846_vm4, %vm1847_vm1  ;;  %v1872_v43 = vand.u32 2147483648, %v1860_v60 }
 0x403   : > { %v1843_v44 = vsub.f32 1.0, %v1842_v0  ;;  %vm1871_vm11 = vcmp.eq.f32.partialorder %v1870_v57, 8.507059e+37 }
 0x404   : > { %v1825_v29 = vmul.f32 %v3138_v35, %v1824_v3  ;;  %v1873_v0 = vor.u32 1.1754944e-38, %v1872_v43 }
 0x405   : > { %v1844_v9 = vmul.f32 %v3140_v59, %v1843_v44 }
 0x406   : > { %v1826_v31 = vadd.f32 %v3138_v35, %v1825_v29 }
 0x407   : > { %v1845_v20 = vadd.f32 %v3140_v59, %v1844_v9 }
 0x408   : > { %v1830_v13 = vsel %vm1829_vm3, %v3138_v35, %v1826_v31  ;;  %v1869_v35 = vsel %vm1868_vm10, %v3136_v12, %v1865_v37 }
 0x409   : > { %v1835_v40 = vsel %vm1832_vm5, %v1834_v18, %v1830_v13  ;;  %v1849_v21 = vsel %vm1848_vm6, %v3140_v59, %v1845_v20  ;;  %v1874_v47 = vsel %vm1871_vm11, %v1873_v0, %v1869_v35 }
 0x40a   : > { %v1854_v17 = vsel %vm1851_vm7, %v1853_v52, %v1849_v21  ;;  %v1877_v26 = vmul.f32 %v3142_v6, %v1835_v40 }
 0x40b   : > { %v1876_v4 = vmul.f32 %v1854_v17, %v4103_v34 }
 0x40d   : > { %v4143_v56 = vadd.f32 %v1877_v26, %v1876_v4 }
 0x40f   : > { %3143 = vtanh.f32 %v4143_v56 }
 0x415   : > { %v3144_v59 = vpop.eup %3143 }
 0x416   : > { %v1880_v3 = vmul.f32 %v3144_v59, %v1874_v47 }
 0x418   : > { %v1881_v22 = vpack.c.bf16 %v1880_v3, %v1880_v3 }
 0x41a   : > { %1895 = vmatmul.bf16.vlgmr.msra.gmra.mxu2 %v1881_v22  ;;  %1908 = vmatmul.bf16.vlgmr.msra.gmra.mxu3 %v1881_v22 }
 0x41b   : > { %1921 = vmatmul.bf16.vlgmr.msrb.gmra.mxu0 %v1881_v22  ;;  %1934 = vmatmul.bf16.vlgmr.msrb.gmra.mxu1 %v1881_v22 }
 0x41c   : > { %2136 = vmatpush.bf16.msra.mxu2 %v3707_v46  ;;  %2149 = vmatpush.bf16.msra.mxu3 %v3709_v49 }
 0x41d   : > { %2162 = vmatpush.bf16.msrb.mxu0 %v3761_v54  ;;  %2175 = vmatpush.bf16.msrb.mxu1 %v3754_v48 }
 0x420   : > { %2137 = vmatpush.bf16.msra.mxu2 %v3712_v53  ;;  %2150 = vmatpush.bf16.msra.mxu3 %v3715_v55  ;;  %v4280_v53 = vld [vmem:[#allocation31_spill] sm:$0xff] }
 0x421   : > { %2163 = vmatpush.bf16.msrb.mxu0 %v3768_v62  ;;  %2176 = vmatpush.bf16.msrb.mxu1 %v3764_v58 }
 0x424   : > { %2138 = vmatpush.bf16.msra.mxu2 %v3718_v61  ;;  %2151 = vmatpush.bf16.msra.mxu3 %v3721_v63 }
 0x425   : > { %2164 = vmatpush.bf16.msrb.mxu0 %v3777_v8  ;;  %2177 = vmatpush.bf16.msrb.mxu1 %v3771_v2 }
 0x428   : > { %2139 = vmatpush.bf16.msra.mxu2 %v3724_v5  ;;  %2152 = vmatpush.bf16.msra.mxu3 %v3727_v7  ;;  %v4281_v7 = vld [vmem:[#allocation28_spill] sm:$0xff] }
 0x429   : > { %2165 = vmatpush.bf16.msrb.mxu0 %v3786_v15  ;;  %2178 = vmatpush.bf16.msrb.mxu1 %v3780_v11 }
 0x42c   : > { %2140 = vmatpush.bf16.msra.mxu2 %v3730_v14  ;;  %2153 = vmatpush.bf16.msra.mxu3 %v3734_v16  ;;  %v4282_v16 = vld [vmem:[#allocation29_spill] sm:$0xff] }
 0x42d   : > { %2166 = vmatpush.bf16.msrb.mxu0 %v3798_v25  ;;  %2179 = vmatpush.bf16.msrb.mxu1 %v3792_v19  ;;  %v4283_v25 = vld [vmem:[#allocation30_spill] sm:$0xff] }
 0x430   : > { %2141 = vmatpush.bf16.msra.mxu2 %v3737_v23  ;;  %2154 = vmatpush.bf16.msra.mxu3 %v3740_v24 }
 0x431   : > { %2167 = vmatpush.bf16.msrb.mxu0 %v3812_v33  ;;  %2180 = vmatpush.bf16.msrb.mxu1 %v3802_v28 }
 0x434   : > { %2142 = vmatpush.bf16.msra.mxu2 %v3743_v30  ;;  %2155 = vmatpush.bf16.msra.mxu3 %v3746_v32 }
 0x435   : > { %2168 = vmatpush.bf16.msrb.mxu0 %v3820_v41  ;;  %2181 = vmatpush.bf16.msrb.mxu1 %v3815_v36 }
 0x438   : > { %2143 = vmatpush.bf16.msra.mxu2 %v3749_v39  ;;  %2156 = vmatpush.bf16.msra.mxu3 %v3752_v42 }
 0x439   : > { %2169 = vmatpush.bf16.msrb.mxu0 %v3828_v51  ;;  %2182 = vmatpush.bf16.msrb.mxu1 %v3823_v45 }
 0x498   : > { %v1922_v46 = vpop.f32.mrf.mxu0  ;;  %v1935_v49 = vpop.f32.mrf.mxu1 }
 0x499   : > { %v1942_v55 = vadd.f32 %v1935_v49, %v4280_v53  ;;  %v1941_v28 = vadd.f32 %v1922_v46, %v4283_v25  ;;  %v4284_v46 = vld [vmem:[#allocation27_spill] sm:$0xff]  ;;  %v4289_v25 = vld [vmem:[#allocation21_spill] sm:$0xff] }
 0x49b   : > { %v2856_v61 = vmul.f32 -1.442695, %v1942_v55  ;;  %v4285_v55 = vld [vmem:[#allocation17_spill] sm:$0xff] }
 0x49d   : > { %3145 = vpow2.f32 %v2856_v61  ;;  %v1896_v63 = vpop.f32.mrf.mxu2  ;;  %v1909_v5 = vpop.f32.mrf.mxu3  ;;  %v4286_v61 = vld [vmem:[#allocation23_spill] sm:$0xff] }
 0x49e   : > { %v1939_v14 = vadd.f32 %v1896_v63, %v4281_v7  ;;  %v1940_v23 = vadd.f32 %v1909_v5, %v4282_v16  ;;  %v763_v63 = vadd.f32 %v4286_v61, %v4285_v55  ;;  %v4287_v5 = vld [vmem:[#allocation18_spill] sm:$0xff]  ;;  %v4288_v7 = vld [vmem:[#allocation25_spill] sm:$0xff]  ;;  %v2989_v55 = vld [vmem:[#allocation10 + $0x30] sm:$0xff] }
 0x49f   : > { %v2988_v61 = vld [vmem:[#allocation10 + $0x28] sm:$0xff] }
 0x4a0   : > { %v2854_v24 = vmul.f32 -1.442695, %v1939_v14  ;;  %v2855_v30 = vmul.f32 -1.442695, %v1940_v23  ;;  %v1924_v32 = vpop.f32.mrf.mxu0  ;;  %v1937_v39 = vpop.f32.mrf.mxu1  ;;  %v792_v14 = vadd.f32 %v4288_v7, %v4287_v5 }
 0x4a2   : > { %3147 = vpow2.f32 %v2854_v24 }
 0x4a3   : > { %v3146_v42 = vpop.eup %3145  ;;  %3149 = vpow2.f32 %v2855_v30 }
 0x4a4   : > { %v1985_v58 = vadd.f32 1.0, %v3146_v42 }
 0x4a5   : > { %v1898_v48 = vpop.f32.mrf.mxu2  ;;  %v1911_v54 = vpop.f32.mrf.mxu3 }
 0x4a6   : > { %3151 = vrcp.f32 %v1985_v58  ;;  %v1997_v37 = vand.u32 2147483648, %v1985_v58  ;;  %vm1991_vm5 = vweird.f32 %v1985_v58  ;;  %v1995_v43 = vand.u32 2147483647, %v1985_v58 }
 0x4a8   : > { %v3148_v62 = vpop.eup %3147  ;;  %v1998_v35 = vor.u32 1.1754944e-38, %v1997_v37  ;;  %vm1996_vm7 = vcmp.eq.f32.partialorder %v1995_v43, 8.507059e+37 }
 0x4a9   : > { %v3150_v2 = vpop.eup %3149  ;;  %v1946_v8 = vadd.f32 1.0, %v3148_v62 }
 0x4aa   : > { %v1965_v11 = vadd.f32 1.0, %v3150_v2 }
 0x4ab   : > { %3153 = vrcp.f32 %v1946_v8  ;;  %v1958_v34 = vand.u32 2147483648, %v1946_v8  ;;  %v1956_v44 = vand.u32 2147483647, %v1946_v8  ;;  %vm1952_vm14 = vweird.f32 %v1946_v8 }
 0x4ac   : > { %3155 = vrcp.f32 %v1965_v11  ;;  %v3152_v15 = vpop.eup %3151  ;;  %v1977_v29 = vand.u32 2147483648, %v1965_v11  ;;  %v1975_v50 = vand.u32 2147483647, %v1965_v11  ;;  %vm1971_vm0 = vweird.f32 %v1965_v11 }
 0x4ad   : > { %v1987_v45 = vmul.f32 %v3152_v15, %v1985_v58  ;;  %3157 = vtanh.f32 %v1941_v28  ;;  %v1959_v27 = vor.u32 1.1754944e-38, %v1958_v34  ;;  %vm1957_vm1 = vcmp.eq.f32.partialorder %v1956_v44, 8.507059e+37  ;;  %v4290_v28 = vld [vmem:[#allocation26_spill] sm:$0xff] }
 0x4ae   : > { %v1978_v20 = vor.u32 1.1754944e-38, %v1977_v29  ;;  %vm1976_vm3 = vcmp.eq.f32.partialorder %v1975_v50, 8.507059e+37  ;;  %vm1992_vm4 = vweird.f32 %v3152_v15 }
 0x4af   : > { %v1988_v9 = vsub.f32 1.0, %v1987_v45  ;;  %vm1993_vm6 = vmor %vm1991_vm5, %vm1992_vm4 }
 0x4b1   : > { %v3154_v19 = vpop.eup %3153  ;;  %v1989_v21 = vmul.f32 %v3152_v15, %v1988_v9 }
 0x4b2   : > { %v3156_v33 = vpop.eup %3155  ;;  %v1948_v36 = vmul.f32 %v3154_v19, %v1946_v8  ;;  %vm1953_vm12 = vweird.f32 %v3154_v19 }
 0x4b3   : > { %v1967_v41 = vmul.f32 %v3156_v33, %v1965_v11  ;;  %vm1972_vm13 = vweird.f32 %v3156_v33  ;;  %vm1954_vm15 = vmor %vm1952_vm14, %vm1953_vm12  ;;  %v3158_v13 = vpop.eup %3157  ;;  %v1990_v4 = vadd.f32 %v3152_v15, %v1989_v21 }
 0x4b4   : > { %v1949_v51 = vsub.f32 1.0, %v1948_v36  ;;  %vm1973_vm2 = vmor %vm1971_vm0, %vm1972_vm13 }
 0x4b5   : > { %v1968_v60 = vsub.f32 1.0, %v1967_v41  ;;  %v1994_v57 = vsel %vm1993_vm6, %v3152_v15, %v1990_v4 }
 0x4b6   : > { %v1950_v12 = vmul.f32 %v3154_v19, %v1949_v51  ;;  %v1999_v59 = vsel %vm1996_vm7, %v1998_v35, %v1994_v57 }
 0x4b7   : > { %v1969_v1 = vmul.f32 %v3156_v33, %v1968_v60 }
 0x4b8   : > { %v1951_v10 = vadd.f32 %v3154_v19, %v1950_v12 }
 0x4b9   : > { %v1970_v31 = vadd.f32 %v3156_v33, %v1969_v1 }
 0x4ba   : > { %v1955_v18 = vsel %vm1954_vm15, %v3154_v19, %v1951_v10 }
 0x4bb   : > { %v1960_v52 = vsel %vm1957_vm1, %v1959_v27, %v1955_v18  ;;  %v1974_v6 = vsel %vm1973_vm2, %v3156_v33, %v1970_v31  ;;  %v821_v33 = vadd.f32 %v4290_v28, %v4289_v25 }
 0x4bc   : > { %v1979_v40 = vsel %vm1976_vm3, %v1978_v20, %v1974_v6  ;;  %v2002_v17 = vmul.f32 %v3158_v13, %v1960_v52 }
 0x4bd   : > { %v2001_v38 = vmul.f32 %v1979_v40, %v4143_v56 }
 0x4bf   : > { %v4183_v26 = vadd.f32 %v2002_v17, %v2001_v38 }
 0x4c1   : > { %3159 = vtanh.f32 %v4183_v26 }
 0x4c7   : > { %v3160_v0 = vpop.eup %3159 }
 0x4c8   : > { %v2005_v47 = vmul.f32 %v3160_v0, %v1999_v59 }
 0x4ca   : > { %v2006_v3 = vpack.c.bf16 %v2005_v47, %v2005_v47 }
 0x4cc   : > { %2020 = vmatmul.bf16.vlgmr.msrb.gmra.mxu2 %v2006_v3  ;;  %2033 = vmatmul.bf16.vlgmr.msrb.gmra.mxu3 %v2006_v3 }
 0x4cd   : > { %2046 = vmatmul.bf16.vlgmr.msra.gmra.mxu0 %v2006_v3  ;;  %2059 = vmatmul.bf16.vlgmr.msra.gmra.mxu1 %v2006_v3 }
 0x54a   : > { %v2047_v56 = vpop.f32.mrf.mxu0  ;;  %v2060_v22 = vpop.f32.mrf.mxu1 }
 0x54b   : > { %v2067_v49 = vadd.f32 %v2060_v22, %v4284_v46  ;;  %v2066_v45 = vadd.f32 %v2047_v56, %v821_v33  ;;  %v2983_v33 = vld [vmem:[#allocation10] sm:$0xff] }
 0x54d   : > { %v2859_v53 = vmul.f32 -1.442695, %v2067_v49 }
 0x54f   : > { %3161 = vpow2.f32 %v2859_v53  ;;  %v2021_v16 = vpop.f32.mrf.mxu2  ;;  %v2034_v23 = vpop.f32.mrf.mxu3 }
 0x550   : > { %v2064_v24 = vadd.f32 %v2021_v16, %v763_v63  ;;  %v2065_v30 = vadd.f32 %v2034_v23, %v792_v14  ;;  %v2987_v63 = vld [vmem:[#allocation10 + $0x20] sm:$0xff]  ;;  %v4291_v14 = vld [vmem:[#allocation24_spill] sm:$0xff] }
 0x552   : > { %v2857_v32 = vmul.f32 -1.442695, %v2064_v24  ;;  %v2858_v39 = vmul.f32 -1.442695, %v2065_v30  ;;  %v2049_v42 = vpop.f32.mrf.mxu0  ;;  %v2062_v48 = vpop.f32.mrf.mxu1  ;;  %v2986_v24 = vld [vmem:[#allocation10 + $0x18] sm:$0xff] }
 0x553   : > { %v4292_v42 = vld [vmem:[#allocation19_spill] sm:$0xff] }
 0x554   : > { %3163 = vpow2.f32 %v2857_v32 }
 0x555   : > { %v3162_v54 = vpop.eup %3161  ;;  %3165 = vpow2.f32 %v2858_v39  ;;  %v2985_v39 = vld [vmem:[#allocation10 + $0x10] sm:$0xff] }
 0x556   : > { %v2110_v2 = vadd.f32 1.0, %v3162_v54  ;;  %v4293_v54 = vld [vmem:[#allocation20_spill] sm:$0xff] }
 0x557   : > { %v2023_v58 = vpop.f32.mrf.mxu2  ;;  %v2036_v62 = vpop.f32.mrf.mxu3 }
 0x558   : > { %3167 = vrcp.f32 %v2110_v2  ;;  %v2122_v59 = vand.u32 2147483648, %v2110_v2  ;;  %vm2116_vm1 = vweird.f32 %v2110_v2  ;;  %v2120_v47 = vand.u32 2147483647, %v2110_v2 }
 0x55a   : > { %v3164_v8 = vpop.eup %3163  ;;  %v2123_v56 = vor.u32 1.1754944e-38, %v2122_v59  ;;  %vm2121_vm3 = vcmp.eq.f32.partialorder %v2120_v47, 8.507059e+37 }
 0x55b   : > { %v3166_v11 = vpop.eup %3165  ;;  %v2071_v15 = vadd.f32 1.0, %v3164_v8 }
 0x55c   : > { %v2090_v19 = vadd.f32 1.0, %v3166_v11 }
 0x55d   : > { %3169 = vrcp.f32 %v2071_v15  ;;  %v2083_v29 = vand.u32 2147483648, %v2071_v15  ;;  %v2081_v9 = vand.u32 2147483647, %v2071_v15  ;;  %vm2077_vm10 = vweird.f32 %v2071_v15 }
 0x55e   : > { %3171 = vrcp.f32 %v2090_v19  ;;  %v3168_v36 = vpop.eup %3167  ;;  %v2102_v10 = vand.u32 2147483648, %v2090_v19  ;;  %v2100_v31 = vand.u32 2147483647, %v2090_v19  ;;  %vm2096_vm12 = vweird.f32 %v2090_v19 }
 0x55f   : > { %v2112_v12 = vmul.f32 %v3168_v36, %v2110_v2  ;;  %3173 = vtanh.f32 %v2066_v45  ;;  %v2084_v13 = vor.u32 1.1754944e-38, %v2083_v29  ;;  %vm2082_vm13 = vcmp.eq.f32.partialorder %v2081_v9, 8.507059e+37 }
 0x560   : > { %v2103_v40 = vor.u32 1.1754944e-38, %v2102_v10  ;;  %vm2101_vm15 = vcmp.eq.f32.partialorder %v2100_v31, 8.507059e+37  ;;  %vm2117_vm0 = vweird.f32 %v3168_v36 }
 0x561   : > { %v2113_v18 = vsub.f32 1.0, %v2112_v12  ;;  %vm2118_vm2 = vmor %vm2116_vm1, %vm2117_vm0 }
 0x563   : > { %v3170_v41 = vpop.eup %3169  ;;  %v2114_v37 = vmul.f32 %v3168_v36, %v2113_v18 }
 0x564   : > { %v3172_v51 = vpop.eup %3171  ;;  %v2073_v34 = vmul.f32 %v3170_v41, %v2071_v15  ;;  %vm2078_vm8 = vweird.f32 %v3170_v41  ;;  %v2984_v15 = vld [vmem:[#allocation10 + $0x8] sm:$0xff] }
 0x565   : > { %v2092_v60 = vmul.f32 %v3172_v51, %v2090_v19  ;;  %vm2097_vm9 = vweird.f32 %v3172_v51  ;;  %vm2079_vm11 = vmor %vm2077_vm10, %vm2078_vm8  ;;  %v3174_v21 = vpop.eup %3173  ;;  %v2115_v0 = vadd.f32 %v3168_v36, %v2114_v37 }
 0x566   : > { %v2074_v44 = vsub.f32 1.0, %v2073_v34  ;;  %vm2098_vm14 = vmor %vm2096_vm12, %vm2097_vm9 }
 0x567   : > { %v2093_v1 = vsub.f32 1.0, %v2092_v60  ;;  %v2119_v3 = vsel %vm2118_vm2, %v3168_v36, %v2115_v0 }
 0x568   : > { %v2075_v50 = vmul.f32 %v3170_v41, %v2074_v44  ;;  %v2124_v46 = vsel %vm2121_vm3, %v2123_v56, %v2119_v3  ;;  %v4294_v44 = vld [vmem:[#allocation22_spill] sm:$0xff] }
 0x569   : > { %v2094_v27 = vmul.f32 %v3172_v51, %v2093_v1 }
 0x56a   : > { %v2076_v20 = vadd.f32 %v3170_v41, %v2075_v50 }
 0x56b   : > { %v2095_v52 = vadd.f32 %v3172_v51, %v2094_v27 }
 0x56c   : > { %v2080_v6 = vsel %vm2079_vm11, %v3170_v41, %v2076_v20 }
 0x56d   : > { %v2085_v17 = vsel %vm2082_vm13, %v2084_v13, %v2080_v6  ;;  %v2099_v38 = vsel %vm2098_vm14, %v3172_v51, %v2095_v52 }
 0x56e   : > { %v2104_v4 = vsel %vm2101_vm15, %v2103_v40, %v2099_v38  ;;  %v2127_v43 = vmul.f32 %v3174_v21, %v2085_v17 }
 0x56f   : > { %v2126_v57 = vmul.f32 %v2104_v4, %v4183_v26  ;;  %v2990_v26 = vld [vmem:[#allocation10 + $0x38] sm:$0xff] }
 0x570   : > { %2320 = vmatpush.bf16.msrb.mxu2 %v2990_v26 }
 0x571   : > { %v4194_v35 = vadd.f32 %v2127_v43, %v2126_v57 }
 0x573   : > { %3175 = vtanh.f32 %v4194_v35 }
 0x574   : > { %2321 = vmatpush.bf16.msrb.mxu2 %v2989_v55 }
 0x578   : > { %2322 = vmatpush.bf16.msrb.mxu2 %v2988_v61 }
 0x579   : > { %v3176_v22 = vpop.eup %3175 }
 0x57a   : > { %v2130_v49 = vmul.f32 %v3176_v22, %v2124_v46 }
 0x57c   : > { %v2131_v53 = vpack.c.bf16 %v2130_v49, %v2130_v49  ;;  %2323 = vmatpush.bf16.msrb.mxu2 %v2987_v63 }
 0x57e   : > { %2144 = vmatmul.bf16.vlgmr.msra.gmra.mxu2 %v2131_v53  ;;  %2157 = vmatmul.bf16.vlgmr.msra.gmra.mxu3 %v2131_v53 }
 0x57f   : > { %2170 = vmatmul.bf16.vlgmr.msrb.gmra.mxu0 %v2131_v53  ;;  %2183 = vmatmul.bf16.vlgmr.msrb.gmra.mxu1 %v2131_v53 }
 0x580   : > { %2324 = vmatpush.bf16.msrb.mxu2 %v2986_v24 }
 0x584   : > { %2325 = vmatpush.bf16.msrb.mxu2 %v2985_v39 }
 0x588   : > { %2326 = vmatpush.bf16.msrb.mxu2 %v2984_v15 }
 0x58c   : > { %2327 = vmatpush.bf16.msrb.mxu2 %v2983_v33 }
 0x5fc   : > { %v2171_v5 = vpop.f32.mrf.mxu0  ;;  %v2184_v7 = vpop.f32.mrf.mxu1 }
 0x5fd   : > { %v2191_v16 = vadd.f32 %v2184_v7, %v4291_v14  ;;  %v2190_v29 = vadd.f32 %v2171_v5, %v4294_v44 }
 0x5ff   : > { %v2862_v23 = vmul.f32 -1.442695, %v2191_v16 }
 0x601   : > { %3177 = vpow2.f32 %v2862_v23  ;;  %v2145_v30 = vpop.f32.mrf.mxu2  ;;  %v2158_v32 = vpop.f32.mrf.mxu3  ;;  %v4295_v23 = vld [vmem:[#allocation41_spill] sm:$0xff] }
 0x602   : > { %v2188_v48 = vadd.f32 %v2145_v30, %v4292_v42  ;;  %v2189_v58 = vadd.f32 %v2158_v32, %v4293_v54  ;;  %v3064_v42 = vld [vmem:[#allocation3] ss:$0 sm:$0xff] }
 0x604   : > { %v2860_v62 = vmul.f32 -1.442695, %v2188_v48  ;;  %v2861_v2 = vmul.f32 -1.442695, %v2189_v58  ;;  %v2173_v8 = vpop.f32.mrf.mxu0  ;;  %v2186_v11 = vpop.f32.mrf.mxu1 }
 0x606   : > { %3179 = vpow2.f32 %v2860_v62 }
 0x607   : > { %v3178_v19 = vpop.eup %3177  ;;  %3181 = vpow2.f32 %v2861_v2 }
 0x608   : > { %v2234_v36 = vadd.f32 1.0, %v3178_v19 }
 0x609   : > { %v2147_v25 = vpop.f32.mrf.mxu2  ;;  %v2160_v28 = vpop.f32.mrf.mxu3 }
 0x60a   : > { %3183 = vrcp.f32 %v2234_v36  ;;  %v2246_v53 = vand.u32 2147483648, %v2234_v36  ;;  %vm2240_vm13 = vweird.f32 %v2234_v36  ;;  %v2244_v26 = vand.u32 2147483647, %v2234_v36 }
 0x60c   : > { %v3180_v41 = vpop.eup %3179  ;;  %v2247_v61 = vor.u32 1.1754944e-38, %v2246_v53  ;;  %vm2245_vm15 = vcmp.eq.f32.partialorder %v2244_v26, 8.507059e+37 }
 0x60d   : > { %v3182_v45 = vpop.eup %3181  ;;  %v2195_v51 = vadd.f32 1.0, %v3180_v41 }
 0x60e   : > { %v2214_v34 = vadd.f32 1.0, %v3182_v45 }
 0x60f   : > { %3185 = vrcp.f32 %v2195_v51  ;;  %v2207_v31 = vand.u32 2147483648, %v2195_v51  ;;  %v2205_v13 = vand.u32 2147483647, %v2195_v51  ;;  %vm2201_vm6 = vweird.f32 %v2195_v51 }
 0x610   : > { %3187 = vrcp.f32 %v2214_v34  ;;  %v3184_v60 = vpop.eup %3183  ;;  %v2226_v52 = vand.u32 2147483648, %v2214_v34  ;;  %v2224_v40 = vand.u32 2147483647, %v2214_v34  ;;  %vm2220_vm8 = vweird.f32 %v2214_v34 }
 0x611   : > { %v2236_v10 = vmul.f32 %v3184_v60, %v2234_v36  ;;  %3189 = vtanh.f32 %v2190_v29  ;;  %v2208_v38 = vor.u32 1.1754944e-38, %v2207_v31  ;;  %vm2206_vm9 = vcmp.eq.f32.partialorder %v2205_v13, 8.507059e+37 }
 0x612   : > { %v2227_v43 = vor.u32 1.1754944e-38, %v2226_v52  ;;  %vm2225_vm11 = vcmp.eq.f32.partialorder %v2224_v40, 8.507059e+37  ;;  %vm2241_vm12 = vweird.f32 %v3184_v60 }
 0x613   : > { %v2237_v21 = vsub.f32 1.0, %v2236_v10  ;;  %vm2242_vm14 = vmor %vm2240_vm13, %vm2241_vm12 }
 0x615   : > { %v3186_v12 = vpop.eup %3185  ;;  %v2238_v47 = vmul.f32 %v3184_v60, %v2237_v21 }
 0x616   : > { %v3188_v1 = vpop.eup %3187  ;;  %v2197_v50 = vmul.f32 %v3186_v12, %v2195_v51  ;;  %vm2202_vm4 = vweird.f32 %v3186_v12 }
 0x617   : > { %v2216_v9 = vmul.f32 %v3188_v1, %v2214_v34  ;;  %vm2221_vm5 = vweird.f32 %v3188_v1  ;;  %vm2203_vm7 = vmor %vm2201_vm6, %vm2202_vm4  ;;  %v3190_v57 = vpop.eup %3189  ;;  %v2239_v49 = vadd.f32 %v3184_v60, %v2238_v47 }
 0x618   : > { %v2198_v27 = vsub.f32 1.0, %v2197_v50  ;;  %vm2222_vm10 = vmor %vm2220_vm8, %vm2221_vm5 }
 0x619   : > { %v2217_v18 = vsub.f32 1.0, %v2216_v9  ;;  %v2243_v55 = vsel %vm2242_vm14, %v3184_v60, %v2239_v49 }
 0x61a   : > { %v2199_v20 = vmul.f32 %v3186_v12, %v2198_v27  ;;  %v2248_v5 = vsel %vm2245_vm15, %v2247_v61, %v2243_v55 }
 0x61b   : > { %v2218_v6 = vmul.f32 %v3188_v1, %v2217_v18 }
 0x61c   : > { %v2200_v17 = vadd.f32 %v3186_v12, %v2199_v20 }
 0x61d   : > { %v2219_v4 = vadd.f32 %v3188_v1, %v2218_v6 }
 0x61e   : > { %v2204_v37 = vsel %vm2203_vm7, %v3186_v12, %v2200_v17 }
 0x61f   : > { %v2209_v0 = vsel %vm2206_vm9, %v2208_v38, %v2204_v37  ;;  %v2223_v59 = vsel %vm2222_vm10, %v3188_v1, %v2219_v4 }
 0x620   : > { %v2251_v3 = vmul.f32 %v3190_v57, %v2209_v0  ;;  %v2228_v56 = vsel %vm2225_vm11, %v2227_v43, %v2223_v59 }
 0x621   : > { %v2250_v22 = vmul.f32 %v2228_v56, %v4194_v35  ;;  %v3063_v35 = vld [vmem:[%s4229_s8] ss:$0 sm:$0xff] }
 0x623   : > { %v2252_v46 = vadd.f32 %v2251_v3, %v2250_v22 }
 0x625   : > { %3191 = vtanh.f32 %v2252_v46 }
 0x62b   : > { %v3192_v63 = vpop.eup %3191 }
 0x62c   : > { %v2254_v7 = vmul.f32 %v3192_v63, %v2248_v5 }
 0x62e   : > { %v2255_v14 = vpack.c.bf16 %v2254_v7, %v2254_v7 }
 0x630   : > { %2328 = vmatmul.bf16.vlgmr.msrb.gmra.mxu2 %v2255_v14 }
 0x6b3   : > { %v2329_v16 = vpop.f32.mrf.mxu2 }
 0x6b4   : > { %v2333_v24 = vadd.f32 %v2329_v16, %v4295_v23 }
 0x6b6   : > { %v2334_v30 = vmax.f32 %v2333_v24, 0.0 }
 0x6b8   : > { %v2339_v32 = vmul.f32 %v3063_v35, %v2334_v30 }
 0x6ba   : > { %2340 = vadd.xlane.f32.xlu0 %v2339_v32 }
 0x6bb   : > { %v2331_v39 = vpop.f32.mrf.mxu2 }
 0x72d   : > { %v2341_v48 = vpop.xlane.xlu0 %2340 }
 0x72e   : > { %v2346_v54 = vadd.f32 %v3064_v42, %v2341_v48 }
 0x730   : > { %v2895_v58 = vmul.f32 -1.442695, %v2346_v54 }
 0x732   : > { %3193 = vpow2.f32 %v2895_v58 }
 0x738   : > { %v3194_v62 = vpop.eup %3193 }
 0x739   : > { %v2350_v2 = vadd.f32 1.0, %v3194_v62 }
 0x73b   : > { %3195 = vrcp.f32 %v2350_v2  ;;  %v2362_v19 = vand.u32 2147483648, %v2350_v2  ;;  %v2360_v28 = vand.u32 2147483647, %v2350_v2  ;;  %vm2356_vm1 = vweird.f32 %v2350_v2 }
 0x73d   : > { %v2363_v36 = vor.u32 1.1754944e-38, %v2362_v19  ;;  %vm2361_vm3 = vcmp.eq.f32.partialorder %v2360_v28, 8.507059e+37 }
 0x741   : > { %v3196_v8 = vpop.eup %3195 }
 0x742   : > { %v2352_v11 = vmul.f32 %v3196_v8, %v2350_v2  ;;  %vm2357_vm0 = vweird.f32 %v3196_v8 }
 0x743   : > { %vm2358_vm2 = vmor %vm2356_vm1, %vm2357_vm0 }
 0x744   : > { %v2353_v15 = vsub.f32 1.0, %v2352_v11 }
 0x746   : > { %v2354_v25 = vmul.f32 %v3196_v8, %v2353_v15 }
 0x748   : > { %v2355_v33 = vadd.f32 %v3196_v8, %v2354_v25 }
 0x74a   : > { %v2359_v41 = vsel %vm2358_vm2, %v3196_v8, %v2355_v33 }
 0x74b   : > { %v2364_v45 = vsel %vm2361_vm3, %v2363_v36, %v2359_v41 }
 0x74c   : > { %2368 = vperm.xlu0 %3061, %v2364_v45  }
 0x7be   : > { %v2369_v51 = vpop.permute.xlu0 %2368 }
 0x7bf   : > { %2371 = vst [vmem:[%s515_s24] sm:$0xff] %v2369_v51 }
 0x7c0 PF: > { %s4296_s17 = sld [smem:[#allocation15_spill]]  ;;  %s4298_s15 = smov %s3347_s16 }
 0x7c1   : > { %s4297_s18 = sld [smem:[#allocation16_spill]] }
 0x7c6   : > { %p22_p12 = scmp.ge.s32.totalorder %s4296_s17, 4  }
 0x7c7   : > { %s4299_s16 = smov %s4297_s18 }
 0x7c8   :  { %24 = sbr.rel (!%p22_p12) target bundleno = 7 (0x7), region = 163 }
 0x7cd   :  { %2391 = vsyncpa [#allocation6], 1 }
 0x7ce   :  { %2393 = vsyncpa [#allocation6 + $0x1], 1 }
 0x7cf   :  { %2394 = vsyncpa [#allocation8], 1 }
 0x7d0   :  { %2395 = vsyncpa [#allocation11], 1 }

</bundles_post_ra>
